<compile_context>
chip_gen: v7x
topology: tpu7x:2x2x1
jax: 0.10.0
libtpu: 0.0.40
codegen_flags: <defaults>
</compile_context>

<pallas_src>
import math

import jax
import jax.numpy as jnp
from jax.experimental import pallas as pl
from jax.experimental.pallas import tpu as pltpu

SQRT_HALF = math.sqrt(0.5)
NEG_BIG = -1e30  # additive mask value (finite -> NaN-safe, underflows to 0 in exp)


def _round_up(x, m):
    return (x + m - 1) // m * m


def _vmem_capacity_bytes():
    try:
        return int(pltpu.get_tpu_info().vmem_capacity_bytes)
    except Exception:
        return 64 * 1024 * 1024  # conservative (v7x-sized) fallback


def _attention_kernel(x_ref, tgt_ref, ka_ref, vb_ref, nmask_ref,
                      win_ref, bin_ref, wout_ref, bout_ref,
                      out_ref, attn_ref):
    # Block shapes (all lane-dense, padded):
    #   x_ref     : (bB, tT, Cp)  f32   (also the residual)
    #   tgt_ref   : (bB, tT, Ep)  f32
    #   ka_ref    : (bB, Ep, Sp)  bf16  (encoder_out[0], resident across T tiles)
    #   vb_ref    : (bB, Sp, Ep)  bf16  (encoder_out[1], resident across T tiles)
    #   nmask_ref : (bB, 1,  Sp)  f32   additive mask (0 valid, -1e30 padded)
    #   win_ref   : (Cp, Ep)      bf16
    #   bin_ref   : (1,  Ep)      f32
    #   wout_ref  : (Ep, Cp)      bf16  (pre-scaled by s_scale * sqrt(0.5))
    #   bout_ref  : (1,  Cp)      f32   (pre-scaled by sqrt(0.5))
    #   out_ref   : (bB, tT, Cp)  f32
    #   attn_ref  : (bB, tT, Sp)  bf16  (softmax math stays f32; store is cast)
    f32 = jnp.float32
    bf16 = jnp.bfloat16

    x = x_ref[...]                                   # (bB, tT, Cp) f32 residual
    bB, tT, Cp = x.shape
    Ep = win_ref.shape[1]

    # --- in-projection: flatten (bB*tT) rows into one tall-M MXU matmul ---
    xi = jnp.dot(x.reshape(bB * tT, Cp).astype(bf16), win_ref[...],
                 preferred_element_type=f32).reshape(bB, tT, Ep)
    xi = (xi + bin_ref[...] + tgt_ref[...]) * SQRT_HALF

    # --- scores = bmm(xi, K) + additive padding mask ---
    scores = jnp.einsum('bte,bes->bts', xi.astype(bf16), ka_ref[...],
                        preferred_element_type=f32)          # (bB, tT, Sp)
    scores = scores + nmask_ref[...]

    # --- softmax over S (f32 math; exact reciprocal: attn is user-visible) ---
    m = jnp.max(scores, axis=-1, keepdims=True)
    e = jnp.exp(scores - m)
    denom = jnp.sum(e, axis=-1, keepdims=True)
    attn = e * pl.reciprocal(denom)
    attn_ref[...] = attn.astype(attn_ref.dtype)               # bf16 writeback

    # --- context = bmm(attn, V); s_scale already folded into w_out ---
    ctx = jnp.einsum('bts,bse->bte', attn.astype(bf16), vb_ref[...],
                     preferred_element_type=f32)              # (bB, tT, Ep)

    # --- out-projection (scaled) + scaled bias + scaled residual ---
    out = jnp.dot(ctx.reshape(bB * tT, Ep).astype(bf16), wout_ref[...],
                  preferred_element_type=f32).reshape(bB, tT, Cp)
    out_ref[...] = out + bout_ref[...] + x * SQRT_HALF


def prepare_encoder_state(encoder_a, encoder_b, encoder_padding_mask):
    """Pad / cast encoder-side operands once (cacheable across decoder steps).

    encoder_a : (B, E, S) f32, encoder_b : (B, S, E) f32,
    encoder_padding_mask : (B, S) f32 (1.0 == padded position).
    Casts to bf16 BEFORE padding so the pad op moves half the bytes.
    """
    _, E, S = encoder_a.shape
    Ep = _round_up(E, 128)
    Sp = _round_up(S, 128)
    bf16 = jnp.bfloat16
    f32 = jnp.float32

    ka_p = jnp.pad(encoder_a.astype(bf16), ((0, 0), (0, Ep - E), (0, Sp - S)))
    vb_p = jnp.pad(encoder_b.astype(bf16), ((0, 0), (0, Sp - S), (0, Ep - E)))

    # Additive mask: 0 where valid, -1e30 where padded (real + lane padding).
    nmask = encoder_padding_mask.astype(f32) * jnp.float32(NEG_BIG)       # (B, S)
    nmask = jnp.pad(nmask, ((0, 0), (0, Sp - S)), constant_values=NEG_BIG)
    nmask = nmask[:, None, :]                                             # (B, 1, Sp)
    return ka_p, vb_p, nmask, S


def _vmem_estimate(bb, bt, Cp, Ep, Sp, single_buffer_resident):
    """Rough per-grid-step VMEM footprint in bytes."""
    nres = 1 if single_buffer_resident else 2
    est = 0
    est += 2 * bb * bt * Cp * 4            # x (f32, double-buffered)
    est += 2 * bb * bt * Ep * 4            # target embedding
    est += nres * bb * Ep * Sp * 2         # K (bf16, resident)
    est += nres * bb * Sp * Ep * 2         # V (bf16, resident)
    est += nres * bb * Sp * 4              # additive mask
    est += nres * (Cp * Ep + Ep * Cp) * 2  # projection weights (bf16)
    est += nres * (Ep + Cp) * 4            # biases
    est += 2 * bb * bt * Cp * 4            # out (f32, double-buffered)
    est += 2 * bb * bt * Sp * 2            # attn (bf16, double-buffered)
    est += 3 * bb * bt * Sp * 4            # scores / exp / attn f32 live copies
    est += 2 * bb * bt * Ep * 4            # xi / ctx f32
    return est


def attention_layer(x, target_embedding, encoder_a, encoder_b,
                    encoder_padding_mask, w_in, b_in, w_out, b_out,
                    *, block_t=None, block_b=None, encoder_state=None,
                    attn_dtype=jnp.bfloat16):
    """Pallas implementation of AttentionLayer.forward.

    x                 : (B, T, C)  f32
    target_embedding  : (B, T, E)  f32
    encoder_a         : (B, E, S)  f32   (encoder_out[0])
    encoder_b         : (B, S, E)  f32   (encoder_out[1])
    encoder_padding_mask : (B, S)  f32   (1.0 = padded)
    w_in  : (C, E) == torch in_projection.weight.T ;  b_in  : (1, E)
    w_out : (E, C) == torch out_projection.weight.T;  b_out : (1, C)

    Returns (out, attn_scores); attn_scores dtype is `attn_dtype` (bf16 by
    default to halve the dominant HBM writeback — softmax math is f32).
    """
    B, T, C = x.shape
    E = w_in.shape[1]
    S = encoder_a.shape[2]
    assert S > 0, "S == 0 (empty encoder output) is degenerate and not supported"

    s_scale = S * math.sqrt(1.0 / S)

    # Lane-dense padded dims (multiples of 128 on every generation).
    Cp = _round_up(C, 128)
    Ep = _round_up(E, 128)
    Sp = _round_up(S, 128)

    f32 = jnp.float32
    bf16 = jnp.bfloat16

    # --- generation-aware VMEM budget / tile caps -------------------------
    vmem_cap = _vmem_capacity_bytes()
    vmem_limit = (vmem_cap * 3) // 4            # ~96 MiB v5e/v6e, ~48 MiB v7x
    row_cap = 2048 if vmem_cap >= 96 * 1024 * 1024 else 1024

    # T tile: multiple of 16 (bf16 sublane packing), as large as T allows.
    if block_t is None:
        block_t = min(_round_up(T, 16), 256)
    Tp = _round_up(T, block_t)

    # Collapse batches only while the flattened row count and the VMEM
    # estimate fit; shrink block_b first (never block_t) when over budget.
    if block_b is None:
        block_b = 1
        for d in range(1, B + 1):
            if B % d != 0:
                continue
            if d * block_t > row_cap:
                continue
            if _vmem_estimate(d, block_t, Cp, Ep, Sp, True) > int(vmem_limit * 0.8):
                continue
            block_b = d

    # Megacore: guarantee >= 2 grid steps along a parallel axis so that both
    # TensorCores (v7x) get work; harmless on single-TC generations.
    if (B // block_b) * (Tp // block_t) < 2:
        if B > 1:
            block_b = max(d for d in range(1, B) if B % d == 0)
        elif T >= 32:
            block_t = _round_up((T + 1) // 2, 16)
            Tp = _round_up(T, block_t)

    # --- pad / cast operands (bf16 before pad; encoder side cacheable) -----
    def pad_to(a, shape):
        return jnp.pad(a, [(0, s - d) for d, s in zip(a.shape, shape)])

    x_p = pad_to(x.astype(f32), (B, Tp, Cp))
    tgt_p = pad_to(target_embedding.astype(f32), (B, Tp, Ep))

    if encoder_state is None:
        encoder_state = prepare_encoder_state(encoder_a, encoder_b,
                                              encoder_padding_mask)
    ka_p, vb_p, nmask, _ = encoder_state

    w_in_p = pad_to(w_in.astype(bf16), (Cp, Ep))
    b_in_p = pad_to(b_in.astype(f32).reshape(1, -1), (1, Ep))
    # Fold s_scale and the trailing sqrt(0.5) into the out-projection params.
    w_out_p = pad_to((w_out * (s_scale * SQRT_HALF)).astype(bf16), (Ep, Cp))
    b_out_p = pad_to((b_out * SQRT_HALF).astype(f32).reshape(1, -1), (1, Cp))

    grid = (B // block_b, Tp // block_t)
    args = (x_p, tgt_p, ka_p, vb_p, nmask, w_in_p, b_in_p, w_out_p, b_out_p)

    def run(single_buffer_resident):
        res_kwargs = {}
        if single_buffer_resident and hasattr(pl, "Buffered"):
            # Resident blocks are constant along the T axis -> a second
            # pipeline buffer would never be used; single-buffer them.
            res_kwargs = dict(pipeline_mode=pl.Buffered(1))

        def res_spec(shape, imap):
            return pl.BlockSpec(shape, imap, **res_kwargs)

        return pl.pallas_call(
            _attention_kernel,
            out_shape=(
                jax.ShapeDtypeStruct((B, Tp, Cp), f32),
                jax.ShapeDtypeStruct((B, Tp, Sp), attn_dtype),
            ),
            grid_spec=pltpu.PrefetchScalarGridSpec(
                num_scalar_prefetch=0,
                grid=grid,
                in_specs=[
                    pl.BlockSpec((block_b, block_t, Cp), lambda b, t: (b, t, 0)),  # x
                    pl.BlockSpec((block_b, block_t, Ep), lambda b, t: (b, t, 0)),  # tgt emb
                    res_spec((block_b, Ep, Sp), lambda b, t: (b, 0, 0)),           # K
                    res_spec((block_b, Sp, Ep), lambda b, t: (b, 0, 0)),           # V
                    res_spec((block_b, 1, Sp), lambda b, t: (b, 0, 0)),            # mask
                    res_spec((Cp, Ep), lambda b, t: (0, 0)),                       # w_in
                    res_spec((1, Ep), lambda b, t: (0, 0)),                        # b_in
                    res_spec((Ep, Cp), lambda b, t: (0, 0)),                       # w_out
                    res_spec((1, Cp), lambda b, t: (0, 0)),                        # b_out
                ],
                out_specs=[
                    pl.BlockSpec((block_b, block_t, Cp), lambda b, t: (b, t, 0)),  # out
                    pl.BlockSpec((block_b, block_t, Sp), lambda b, t: (b, t, 0)),  # attn
                ],
            ),
            compiler_params=pltpu.CompilerParams(
                dimension_semantics=("parallel", "parallel"),
                vmem_limit_bytes=int(vmem_limit)),
        )(*args)

    try:
        out_p, attn_p = run(True)
    except Exception:
        # Fallback for Pallas versions without single-buffer pipeline_mode.
        out_p, attn_p = run(False)

    return out_p[:, :T, :C], attn_p[:, :T, :S]


def attention_layer_ref_f32(x, tgt, enc_a, enc_b, mask, w_in, b_in, w_out, b_out):
    """Pure-JAX f32 reference mirroring the torch module exactly."""
    residual = x
    xi = (jnp.einsum('btc,ce->bte', x, w_in) + b_in + tgt) * SQRT_HALF
    scores = jnp.einsum('bte,bes->bts', xi, enc_a)
    scores = jnp.where(mask[:, None, :] > 0.5, -jnp.inf, scores)
    attn = jax.nn.softmax(scores, axis=-1)
    S = enc_b.shape[1]
    s_scale = math.sqrt(S) if S == 0 else S * math.sqrt(1.0 / S)
    ctx = jnp.einsum('bts,bse->bte', attn, enc_b) * s_scale
    out = (jnp.einsum('bte,ec->btc', ctx, w_out) + b_out + residual) * SQRT_HALF
    return out, attn


def attention_layer_ref_bf16(x, tgt, enc_a, enc_b, mask, w_in, b_in, w_out, b_out):
    """Reference that mirrors the kernel's numerics (bf16 MXU operands, f32 acc)."""
    bf = jnp.bfloat16
    f32 = jnp.float32
    S = enc_b.shape[1]
    s_scale = S * math.sqrt(1.0 / S)
    xi = (jnp.einsum('btc,ce->bte', x.astype(bf), w_in.astype(bf),
                     preferred_element_type=f32) + b_in + tgt) * SQRT_HALF
    scores = jnp.einsum('bte,bes->bts', xi.astype(bf), enc_a.astype(bf),
                        preferred_element_type=f32)
    scores = scores + mask[:, None, :] * NEG_BIG
    m = jnp.max(scores, axis=-1, keepdims=True)
    e = jnp.exp(scores - m)
    attn = e / jnp.sum(e, axis=-1, keepdims=True)
    ctx = jnp.einsum('bts,bse->bte', attn.astype(bf), enc_b.astype(bf),
                     preferred_element_type=f32)
    w_out_s = (w_out * (s_scale * SQRT_HALF)).astype(bf)
    out = (jnp.einsum('bte,ec->btc', ctx.astype(bf), w_out_s,
                      preferred_element_type=f32)
           + b_out * SQRT_HALF + x * SQRT_HALF)
    return out, attn


if __name__ == "__main__":
    # Small shapes consistent with the module: conv_channels=4, embed_dim=32.
    B, T, S, C, E = 2, 8, 16, 4, 32

    key = jax.random.PRNGKey(0)
    k = jax.random.split(key, 8)

    x = jax.random.normal(k[0], (B, T, C), jnp.float32)
    tgt = jax.random.normal(k[1], (B, T, E), jnp.float32)
    enc_a = jax.random.normal(k[2], (B, E, S), jnp.float32)   # encoder_out[0]
    enc_b = jax.random.normal(k[3], (B, S, E), jnp.float32)   # encoder_out[1]

    # Padding mask: batch 0 pads positions >= 12, batch 1 has no padding.
    valid_lens = jnp.array([12, 16], jnp.int32)
    pos = jnp.arange(S)[None, :]
    mask = (pos >= valid_lens[:, None]).astype(jnp.float32)   # 1.0 == padded

    # Parameter init matching the torch `linear()` helper:
    #   weight ~ N(0, sqrt(1/in_features)), bias = 0.
    w_in_t = jax.random.normal(k[4], (E, C), jnp.float32) * math.sqrt(1.0 / C)   # torch (out,in)
    w_out_t = jax.random.normal(k[5], (C, E), jnp.float32) * math.sqrt(1.0 / E)
    w_in = w_in_t.T      # (C, E)
    w_out = w_out_t.T    # (E, C)
    b_in = jnp.zeros((1, E), jnp.float32)
    b_out = jnp.zeros((1, C), jnp.float32)

    out_x, attn_scores = attention_layer(
        x, tgt, enc_a, enc_b, mask, w_in, b_in, w_out, b_out)
    jax.block_until_ready((out_x, attn_scores))

    ref_bf_x, ref_bf_attn = attention_layer_ref_bf16(
        x, tgt, enc_a, enc_b, mask, w_in, b_in, w_out, b_out)
    ref_f32_x, ref_f32_attn = attention_layer_ref_f32(
        x, tgt, enc_a, enc_b, mask, w_in, b_in, w_out, b_out)

    assert out_x.shape == (B, T, C) and attn_scores.shape == (B, T, S)
    assert out_x.dtype == jnp.float32

    attn_f32 = attn_scores.astype(jnp.float32)

    # Tight check against the reference that uses the kernel's numerics
    # (bf16 matmul operands, f32 accumulation, additive mask). attn is stored
    # as bf16, so allow its rounding (~4e-3 abs for values in [0, 1]).
    assert jnp.allclose(out_x, ref_bf_x, atol=1e-2, rtol=1e-2)
    assert jnp.allclose(attn_f32, ref_bf_attn, atol=1e-2, rtol=1e-2)

    # Looser sanity check against the exact f32 torch-mirror reference
    # (difference is bf16 matmul / attn-store rounding only).
    assert jnp.allclose(out_x, ref_f32_x, atol=2e-1, rtol=2e-1)
    assert jnp.allclose(attn_f32, ref_f32_attn, atol=1e-1, rtol=1e-1)

    print("KERNEL_OK")
</pallas_src>

<mosaic_0001>
module attributes {stable_mosaic.version = 11 : i64} {
  func.func @_attention_kernel(%arg0: i32, %arg1: i32, %arg2: memref<1x16x128xf32, #tpu.memory_space<vmem>>, %arg3: memref<1x16x128xf32, #tpu.memory_space<vmem>>, %arg4: memref<1x128x128xbf16, #tpu.memory_space<vmem>>, %arg5: memref<1x128x128xbf16, #tpu.memory_space<vmem>>, %arg6: memref<1x1x128xf32, #tpu.memory_space<vmem>>, %arg7: memref<128x128xbf16, #tpu.memory_space<vmem>>, %arg8: memref<1x128xf32, #tpu.memory_space<vmem>>, %arg9: memref<128x128xbf16, #tpu.memory_space<vmem>>, %arg10: memref<1x128xf32, #tpu.memory_space<vmem>>, %arg11: memref<1x16x128xf32, #tpu.memory_space<vmem>>, %arg12: memref<1x16x128xbf16, #tpu.memory_space<vmem>>) attributes {dimension_semantics = [#tpu.dimension_semantics<parallel>, #tpu.dimension_semantics<parallel>], iteration_bounds = array<i64: 2, 1>, scalar_prefetch = 0 : i64, scratch_operands = 0 : i64, tpu.core_type = #tpu.core_type<tc>, window_params = [{transform_indices = @transform_0, window_bounds = array<i64: 1, 16, 128>}, {transform_indices = @transform_1, window_bounds = array<i64: 1, 16, 128>}, {pipeline_mode = #tpu.pipeline_mode<synchronous>, transform_indices = @transform_2, window_bounds = array<i64: 1, 128, 128>}, {pipeline_mode = #tpu.pipeline_mode<synchronous>, transform_indices = @transform_3, window_bounds = array<i64: 1, 128, 128>}, {pipeline_mode = #tpu.pipeline_mode<synchronous>, transform_indices = @transform_4, window_bounds = array<i64: 1, 1, 128>}, {pipeline_mode = #tpu.pipeline_mode<synchronous>, transform_indices = @transform_5, window_bounds = array<i64: 128, 128>}, {pipeline_mode = #tpu.pipeline_mode<synchronous>, transform_indices = @transform_6, window_bounds = array<i64: 1, 128>}, {pipeline_mode = #tpu.pipeline_mode<synchronous>, transform_indices = @transform_7, window_bounds = array<i64: 128, 128>}, {pipeline_mode = #tpu.pipeline_mode<synchronous>, transform_indices = @transform_8, window_bounds = array<i64: 1, 128>}, {transform_indices = @transform_9, window_bounds = array<i64: 1, 16, 128>}, {transform_indices = @transform_10, window_bounds = array<i64: 1, 16, 128>}]} {
    %c0 = arith.constant 0 : index
    %c0_0 = arith.constant 0 : index
    %c0_1 = arith.constant 0 : index
    %0 = vector.load %arg2[%c0, %c0_0, %c0_1] : memref<1x16x128xf32, #tpu.memory_space<vmem>>, vector<1x16x128xf32>
    %1 = vector.shape_cast %0 : vector<1x16x128xf32> to vector<16x128xf32>
    %2 = arith.truncf %1 : vector<16x128xf32> to vector<16x128xbf16>
    %c0_2 = arith.constant 0 : index
    %c0_3 = arith.constant 0 : index
    %3 = vector.load %arg7[%c0_2, %c0_3] : memref<128x128xbf16, #tpu.memory_space<vmem>>, vector<128x128xbf16>
    %cst = arith.constant dense<0.000000e+00> : vector<16x128xf32>
    %4 = tpu.matmul %2, %3, %cst {dimension_numbers = #tpu.dot_dimension_numbers<[1], [0], [0], [1], [0, 0, 1, 1], [], []>} : vector<16x128xbf16>, vector<128x128xbf16>, vector<16x128xf32> -> vector<16x128xf32>
    %5 = vector.shape_cast %4 : vector<16x128xf32> to vector<1x16x128xf32>
    %c0_4 = arith.constant 0 : index
    %c0_5 = arith.constant 0 : index
    %6 = vector.load %arg8[%c0_4, %c0_5] : memref<1x128xf32, #tpu.memory_space<vmem>>, vector<1x128xf32>
    %7 = vector.shape_cast %6 : vector<1x128xf32> to vector<1x1x128xf32>
    %8 = vector.broadcast %7 : vector<1x1x128xf32> to vector<1x16x128xf32>
    %9 = arith.addf %5, %8 : vector<1x16x128xf32>
    %c0_6 = arith.constant 0 : index
    %c0_7 = arith.constant 0 : index
    %c0_8 = arith.constant 0 : index
    %10 = vector.load %arg3[%c0_6, %c0_7, %c0_8] : memref<1x16x128xf32, #tpu.memory_space<vmem>>, vector<1x16x128xf32>
    %11 = arith.addf %9, %10 : vector<1x16x128xf32>
    %cst_9 = arith.constant 0.707106769 : f32
    %12 = vector.broadcast %cst_9 : f32 to vector<1x16x128xf32>
    %13 = arith.mulf %11, %12 : vector<1x16x128xf32>
    %14 = arith.truncf %13 : vector<1x16x128xf32> to vector<1x16x128xbf16>
    %c0_10 = arith.constant 0 : index
    %c0_11 = arith.constant 0 : index
    %c0_12 = arith.constant 0 : index
    %15 = vector.load %arg4[%c0_10, %c0_11, %c0_12] : memref<1x128x128xbf16, #tpu.memory_space<vmem>>, vector<1x128x128xbf16>
    "tpu.trace_start"() <{level = 10 : i32, message = "bte,bes->bts"}> : () -> ()
    %cst_13 = arith.constant dense<0.000000e+00> : vector<1x16x128xf32>
    %16 = tpu.matmul %14, %15, %cst_13 {dimension_numbers = #tpu.dot_dimension_numbers<[2], [1], [1], [2], [0, 0, 0, 1, 1, 2], [0], [0]>} : vector<1x16x128xbf16>, vector<1x128x128xbf16>, vector<1x16x128xf32> -> vector<1x16x128xf32>
    "tpu.trace_stop"() : () -> ()
    %c0_14 = arith.constant 0 : index
    %c0_15 = arith.constant 0 : index
    %c0_16 = arith.constant 0 : index
    %17 = vector.load %arg6[%c0_14, %c0_15, %c0_16] : memref<1x1x128xf32, #tpu.memory_space<vmem>>, vector<1x1x128xf32>
    %18 = vector.broadcast %17 : vector<1x1x128xf32> to vector<1x16x128xf32>
    %19 = arith.addf %16, %18 : vector<1x16x128xf32>
    %cst_17 = arith.constant dense<0xFF800000> : vector<1x16xf32>
    %20 = vector.multi_reduction <maximumf>, %19, %cst_17 [2] : vector<1x16x128xf32> to vector<1x16xf32>
    %21 = vector.shape_cast %20 : vector<1x16xf32> to vector<1x16x1xf32>
    %22 = vector.broadcast %21 : vector<1x16x1xf32> to vector<1x16x128xf32>
    %23 = arith.subf %19, %22 : vector<1x16x128xf32>
    %24 = math.exp %23 : vector<1x16x128xf32>
    %cst_18 = arith.constant dense<0.000000e+00> : vector<1x16xf32>
    %25 = vector.multi_reduction <add>, %24, %cst_18 [2] : vector<1x16x128xf32> to vector<1x16xf32>
    %26 = vector.shape_cast %25 : vector<1x16xf32> to vector<1x16x1xf32>
    %27 = tpu.reciprocal %26 : vector<1x16x1xf32> -> vector<1x16x1xf32>
    %28 = vector.broadcast %27 : vector<1x16x1xf32> to vector<1x16x128xf32>
    %29 = arith.mulf %24, %28 : vector<1x16x128xf32>
    %30 = arith.truncf %29 : vector<1x16x128xf32> to vector<1x16x128xbf16>
    %c0_19 = arith.constant 0 : index
    %c0_20 = arith.constant 0 : index
    %c0_21 = arith.constant 0 : index
    %31 = vector.load %arg12[%c0_19, %c0_20, %c0_21] : memref<1x16x128xbf16, #tpu.memory_space<vmem>>, vector<1x16x128xbf16>
    tpu.vector_store %arg12[%c0_19, %c0_20, %c0_21], %30 {strides = array<i32>} : memref<1x16x128xbf16, #tpu.memory_space<vmem>>, vector<1x16x128xbf16>,
    %32 = arith.truncf %29 : vector<1x16x128xf32> to vector<1x16x128xbf16>
    %c0_22 = arith.constant 0 : index
    %c0_23 = arith.constant 0 : index
    %c0_24 = arith.constant 0 : index
    %33 = vector.load %arg5[%c0_22, %c0_23, %c0_24] : memref<1x128x128xbf16, #tpu.memory_space<vmem>>, vector<1x128x128xbf16>
    "tpu.trace_start"() <{level = 10 : i32, message = "bts,bse->bte"}> : () -> ()
    %cst_25 = arith.constant dense<0.000000e+00> : vector<1x16x128xf32>
    %34 = tpu.matmul %32, %33, %cst_25 {dimension_numbers = #tpu.dot_dimension_numbers<[2], [1], [1], [2], [0, 0, 0, 1, 1, 2], [0], [0]>} : vector<1x16x128xbf16>, vector<1x128x128xbf16>, vector<1x16x128xf32> -> vector<1x16x128xf32>
    "tpu.trace_stop"() : () -> ()
    %35 = vector.shape_cast %34 : vector<1x16x128xf32> to vector<16x128xf32>
    %36 = arith.truncf %35 : vector<16x128xf32> to vector<16x128xbf16>
    %c0_26 = arith.constant 0 : index
    %c0_27 = arith.constant 0 : index
    %37 = vector.load %arg9[%c0_26, %c0_27] : memref<128x128xbf16, #tpu.memory_space<vmem>>, vector<128x128xbf16>
    %cst_28 = arith.constant dense<0.000000e+00> : vector<16x128xf32>
    %38 = tpu.matmul %36, %37, %cst_28 {dimension_numbers = #tpu.dot_dimension_numbers<[1], [0], [0], [1], [0, 0, 1, 1], [], []>} : vector<16x128xbf16>, vector<128x128xbf16>, vector<16x128xf32> -> vector<16x128xf32>
    %39 = vector.shape_cast %38 : vector<16x128xf32> to vector<1x16x128xf32>
    %c0_29 = arith.constant 0 : index
    %c0_30 = arith.constant 0 : index
    %40 = vector.load %arg10[%c0_29, %c0_30] : memref<1x128xf32, #tpu.memory_space<vmem>>, vector<1x128xf32>
    %41 = vector.shape_cast %40 : vector<1x128xf32> to vector<1x1x128xf32>
    %42 = vector.broadcast %41 : vector<1x1x128xf32> to vector<1x16x128xf32>
    %43 = arith.addf %39, %42 : vector<1x16x128xf32>
    %cst_31 = arith.constant 0.707106769 : f32
    %44 = vector.broadcast %cst_31 : f32 to vector<1x16x128xf32>
    %45 = arith.mulf %0, %44 : vector<1x16x128xf32>
    %46 = arith.addf %43, %45 : vector<1x16x128xf32>
    %c0_32 = arith.constant 0 : index
    %c0_33 = arith.constant 0 : index
    %c0_34 = arith.constant 0 : index
    %47 = vector.load %arg11[%c0_32, %c0_33, %c0_34] : memref<1x16x128xf32, #tpu.memory_space<vmem>>, vector<1x16x128xf32>
    tpu.vector_store %arg11[%c0_32, %c0_33, %c0_34], %46 {strides = array<i32>} : memref<1x16x128xf32, #tpu.memory_space<vmem>>, vector<1x16x128xf32>,
    return
  }
  func.func @transform_0(%arg0: i32, %arg1: i32) -> (i32, i32, i32) {
    %c0_i32 = arith.constant 0 : i32
    %c0_i32_0 = arith.constant 0 : i32
    return %arg0, %arg1, %c0_i32 : i32, i32, i32
  }
  func.func @transform_1(%arg0: i32, %arg1: i32) -> (i32, i32, i32) {
    %c0_i32 = arith.constant 0 : i32
    %c0_i32_0 = arith.constant 0 : i32
    return %arg0, %arg1, %c0_i32 : i32, i32, i32
  }
  func.func @transform_2(%arg0: i32, %arg1: i32) -> (i32, i32, i32) {
    %c0_i32 = arith.constant 0 : i32
    %c0_i32_0 = arith.constant 0 : i32
    %c0_i32_1 = arith.constant 0 : i32
    return %arg0, %c0_i32, %c0_i32_0 : i32, i32, i32
  }
  func.func @transform_3(%arg0: i32, %arg1: i32) -> (i32, i32, i32) {
    %c0_i32 = arith.constant 0 : i32
    %c0_i32_0 = arith.constant 0 : i32
    %c0_i32_1 = arith.constant 0 : i32
    return %arg0, %c0_i32, %c0_i32_0 : i32, i32, i32
  }
  func.func @transform_4(%arg0: i32, %arg1: i32) -> (i32, i32, i32) {
    %c0_i32 = arith.constant 0 : i32
    %c0_i32_0 = arith.constant 0 : i32
    %c0_i32_1 = arith.constant 0 : i32
    return %arg0, %c0_i32, %c0_i32_0 : i32, i32, i32
  }
  func.func @transform_5(%arg0: i32, %arg1: i32) -> (i32, i32) {
    %c0_i32 = arith.constant 0 : i32
    %c0_i32_0 = arith.constant 0 : i32
    %c0_i32_1 = arith.constant 0 : i32
    return %c0_i32, %c0_i32_0 : i32, i32
  }
  func.func @transform_6(%arg0: i32, %arg1: i32) -> (i32, i32) {
    %c0_i32 = arith.constant 0 : i32
    %c0_i32_0 = arith.constant 0 : i32
    %c0_i32_1 = arith.constant 0 : i32
    return %c0_i32, %c0_i32_0 : i32, i32
  }
  func.func @transform_7(%arg0: i32, %arg1: i32) -> (i32, i32) {
    %c0_i32 = arith.constant 0 : i32
    %c0_i32_0 = arith.constant 0 : i32
    %c0_i32_1 = arith.constant 0 : i32
    return %c0_i32, %c0_i32_0 : i32, i32
  }
  func.func @transform_8(%arg0: i32, %arg1: i32) -> (i32, i32) {
    %c0_i32 = arith.constant 0 : i32
    %c0_i32_0 = arith.constant 0 : i32
    %c0_i32_1 = arith.constant 0 : i32
    return %c0_i32, %c0_i32_0 : i32, i32
  }
  func.func @transform_9(%arg0: i32, %arg1: i32) -> (i32, i32, i32) {
    %c0_i32 = arith.constant 0 : i32
    %c0_i32_0 = arith.constant 0 : i32
    return %arg0, %arg1, %c0_i32 : i32, i32, i32
  }
  func.func @transform_10(%arg0: i32, %arg1: i32) -> (i32, i32, i32) {
    %c0_i32 = arith.constant 0 : i32
    %c0_i32_0 = arith.constant 0 : i32
    return %arg0, %arg1, %c0_i32 : i32, i32, i32
  }
}

module attributes {stable_mosaic.version = 11 : i64} {
  func.func @_attention_kernel(%arg0: i32, %arg1: i32, %arg2: memref<1x16x128xf32, #tpu.memory_space<vmem>>, %arg3: memref<1x16x128xf32, #tpu.memory_space<vmem>>, %arg4: memref<1x128x128xbf16, #tpu.memory_space<vmem>>, %arg5: memref<1x128x128xbf16, #tpu.memory_space<vmem>>, %arg6: memref<1x1x128xf32, #tpu.memory_space<vmem>>, %arg7: memref<128x128xbf16, #tpu.memory_space<vmem>>, %arg8: memref<1x128xf32, #tpu.memory_space<vmem>>, %arg9: memref<128x128xbf16, #tpu.memory_space<vmem>>, %arg10: memref<1x128xf32, #tpu.memory_space<vmem>>, %arg11: memref<1x16x128xf32, #tpu.memory_space<vmem>>, %arg12: memref<1x16x128xbf16, #tpu.memory_space<vmem>>) attributes {dimension_semantics = [#tpu.dimension_semantics<parallel>, #tpu.dimension_semantics<parallel>], iteration_bounds = array<i64: 2, 1>, scalar_prefetch = 0 : i64, scratch_operands = 0 : i64, tpu.core_type = #tpu.core_type<tc>, window_params = [{transform_indices = @transform_0, window_bounds = array<i64: 1, 16, 128>}, {transform_indices = @transform_1, window_bounds = array<i64: 1, 16, 128>}, {transform_indices = @transform_2, window_bounds = array<i64: 1, 128, 128>}, {transform_indices = @transform_3, window_bounds = array<i64: 1, 128, 128>}, {transform_indices = @transform_4, window_bounds = array<i64: 1, 1, 128>}, {pipeline_mode = #tpu.pipeline_mode<synchronous>, transform_indices = @transform_5, window_bounds = array<i64: 128, 128>}, {pipeline_mode = #tpu.pipeline_mode<synchronous>, transform_indices = @transform_6, window_bounds = array<i64: 1, 128>}, {pipeline_mode = #tpu.pipeline_mode<synchronous>, transform_indices = @transform_7, window_bounds = array<i64: 128, 128>}, {pipeline_mode = #tpu.pipeline_mode<synchronous>, transform_indices = @transform_8, window_bounds = array<i64: 1, 128>}, {transform_indices = @transform_9, window_bounds = array<i64: 1, 16, 128>}, {transform_indices = @transform_10, window_bounds = array<i64: 1, 16, 128>}]} {
    %c0 = arith.constant 0 : index
    %c0_0 = arith.constant 0 : index
    %c0_1 = arith.constant 0 : index
    %0 = vector.load %arg2[%c0, %c0_0, %c0_1] : memref<1x16x128xf32, #tpu.memory_space<vmem>>, vector<1x16x128xf32>
    %1 = vector.shape_cast %0 : vector<1x16x128xf32> to vector<16x128xf32>
    %2 = arith.truncf %1 : vector<16x128xf32> to vector<16x128xbf16>
    %c0_2 = arith.constant 0 : index
    %c0_3 = arith.constant 0 : index
    %3 = vector.load %arg7[%c0_2, %c0_3] : memref<128x128xbf16, #tpu.memory_space<vmem>>, vector<128x128xbf16>
    %cst = arith.constant dense<0.000000e+00> : vector<16x128xf32>
    %4 = tpu.matmul %2, %3, %cst {dimension_numbers = #tpu.dot_dimension_numbers<[1], [0], [0], [1], [0, 0, 1, 1], [], []>} : vector<16x128xbf16>, vector<128x128xbf16>, vector<16x128xf32> -> vector<16x128xf32>
    %5 = vector.shape_cast %4 : vector<16x128xf32> to vector<1x16x128xf32>
    %c0_4 = arith.constant 0 : index
    %c0_5 = arith.constant 0 : index
    %6 = vector.load %arg8[%c0_4, %c0_5] : memref<1x128xf32, #tpu.memory_space<vmem>>, vector<1x128xf32>
    %7 = vector.shape_cast %6 : vector<1x128xf32> to vector<1x1x128xf32>
    %8 = vector.broadcast %7 : vector<1x1x128xf32> to vector<1x16x128xf32>
    %9 = arith.addf %5, %8 : vector<1x16x128xf32>
    %c0_6 = arith.constant 0 : index
    %c0_7 = arith.constant 0 : index
    %c0_8 = arith.constant 0 : index
    %10 = vector.load %arg3[%c0_6, %c0_7, %c0_8] : memref<1x16x128xf32, #tpu.memory_space<vmem>>, vector<1x16x128xf32>
    %11 = arith.addf %9, %10 : vector<1x16x128xf32>
    %cst_9 = arith.constant 0.707106769 : f32
    %12 = vector.broadcast %cst_9 : f32 to vector<1x16x128xf32>
    %13 = arith.mulf %11, %12 : vector<1x16x128xf32>
    %14 = arith.truncf %13 : vector<1x16x128xf32> to vector<1x16x128xbf16>
    %c0_10 = arith.constant 0 : index
    %c0_11 = arith.constant 0 : index
    %c0_12 = arith.constant 0 : index
    %15 = vector.load %arg4[%c0_10, %c0_11, %c0_12] : memref<1x128x128xbf16, #tpu.memory_space<vmem>>, vector<1x128x128xbf16>
    "tpu.trace_start"() <{level = 10 : i32, message = "bte,bes->bts"}> : () -> ()
    %cst_13 = arith.constant dense<0.000000e+00> : vector<1x16x128xf32>
    %16 = tpu.matmul %14, %15, %cst_13 {dimension_numbers = #tpu.dot_dimension_numbers<[2], [1], [1], [2], [0, 0, 0, 1, 1, 2], [0], [0]>} : vector<1x16x128xbf16>, vector<1x128x128xbf16>, vector<1x16x128xf32> -> vector<1x16x128xf32>
    "tpu.trace_stop"() : () -> ()
    %c0_14 = arith.constant 0 : index
    %c0_15 = arith.constant 0 : index
    %c0_16 = arith.constant 0 : index
    %17 = vector.load %arg6[%c0_14, %c0_15, %c0_16] : memref<1x1x128xf32, #tpu.memory_space<vmem>>, vector<1x1x128xf32>
    %18 = vector.broadcast %17 : vector<1x1x128xf32> to vector<1x16x128xf32>
    %19 = arith.addf %16, %18 : vector<1x16x128xf32>
    %cst_17 = arith.constant dense<0xFF800000> : vector<1x16xf32>
    %20 = vector.multi_reduction <maximumf>, %19, %cst_17 [2] : vector<1x16x128xf32> to vector<1x16xf32>
    %21 = vector.shape_cast %20 : vector<1x16xf32> to vector<1x16x1xf32>
    %22 = vector.broadcast %21 : vector<1x16x1xf32> to vector<1x16x128xf32>
    %23 = arith.subf %19, %22 : vector<1x16x128xf32>
    %24 = math.exp %23 : vector<1x16x128xf32>
    %cst_18 = arith.constant dense<0.000000e+00> : vector<1x16xf32>
    %25 = vector.multi_reduction <add>, %24, %cst_18 [2] : vector<1x16x128xf32> to vector<1x16xf32>
    %26 = vector.shape_cast %25 : vector<1x16xf32> to vector<1x16x1xf32>
    %27 = tpu.reciprocal %26 : vector<1x16x1xf32> -> vector<1x16x1xf32>
    %28 = vector.broadcast %27 : vector<1x16x1xf32> to vector<1x16x128xf32>
    %29 = arith.mulf %24, %28 : vector<1x16x128xf32>
    %30 = arith.truncf %29 : vector<1x16x128xf32> to vector<1x16x128xbf16>
    %c0_19 = arith.constant 0 : index
    %c0_20 = arith.constant 0 : index
    %c0_21 = arith.constant 0 : index
    %31 = vector.load %arg12[%c0_19, %c0_20, %c0_21] : memref<1x16x128xbf16, #tpu.memory_space<vmem>>, vector<1x16x128xbf16>
    tpu.vector_store %arg12[%c0_19, %c0_20, %c0_21], %30 {strides = array<i32>} : memref<1x16x128xbf16, #tpu.memory_space<vmem>>, vector<1x16x128xbf16>,
    %32 = arith.truncf %29 : vector<1x16x128xf32> to vector<1x16x128xbf16>
    %c0_22 = arith.constant 0 : index
    %c0_23 = arith.constant 0 : index
    %c0_24 = arith.constant 0 : index
    %33 = vector.load %arg5[%c0_22, %c0_23, %c0_24] : memref<1x128x128xbf16, #tpu.memory_space<vmem>>, vector<1x128x128xbf16>
    "tpu.trace_start"() <{level = 10 : i32, message = "bts,bse->bte"}> : () -> ()
    %cst_25 = arith.constant dense<0.000000e+00> : vector<1x16x128xf32>
    %34 = tpu.matmul %32, %33, %cst_25 {dimension_numbers = #tpu.dot_dimension_numbers<[2], [1], [1], [2], [0, 0, 0, 1, 1, 2], [0], [0]>} : vector<1x16x128xbf16>, vector<1x128x128xbf16>, vector<1x16x128xf32> -> vector<1x16x128xf32>
    "tpu.trace_stop"() : () -> ()
    %35 = vector.shape_cast %34 : vector<1x16x128xf32> to vector<16x128xf32>
    %36 = arith.truncf %35 : vector<16x128xf32> to vector<16x128xbf16>
    %c0_26 = arith.constant 0 : index
    %c0_27 = arith.constant 0 : index
    %37 = vector.load %arg9[%c0_26, %c0_27] : memref<128x128xbf16, #tpu.memory_space<vmem>>, vector<128x128xbf16>
    %cst_28 = arith.constant dense<0.000000e+00> : vector<16x128xf32>
    %38 = tpu.matmul %36, %37, %cst_28 {dimension_numbers = #tpu.dot_dimension_numbers<[1], [0], [0], [1], [0, 0, 1, 1], [], []>} : vector<16x128xbf16>, vector<128x128xbf16>, vector<16x128xf32> -> vector<16x128xf32>
    %39 = vector.shape_cast %38 : vector<16x128xf32> to vector<1x16x128xf32>
    %c0_29 = arith.constant 0 : index
    %c0_30 = arith.constant 0 : index
    %40 = vector.load %arg10[%c0_29, %c0_30] : memref<1x128xf32, #tpu.memory_space<vmem>>, vector<1x128xf32>
    %41 = vector.shape_cast %40 : vector<1x128xf32> to vector<1x1x128xf32>
    %42 = vector.broadcast %41 : vector<1x1x128xf32> to vector<1x16x128xf32>
    %43 = arith.addf %39, %42 : vector<1x16x128xf32>
    %cst_31 = arith.constant 0.707106769 : f32
    %44 = vector.broadcast %cst_31 : f32 to vector<1x16x128xf32>
    %45 = arith.mulf %0, %44 : vector<1x16x128xf32>
    %46 = arith.addf %43, %45 : vector<1x16x128xf32>
    %c0_32 = arith.constant 0 : index
    %c0_33 = arith.constant 0 : index
    %c0_34 = arith.constant 0 : index
    %47 = vector.load %arg11[%c0_32, %c0_33, %c0_34] : memref<1x16x128xf32, #tpu.memory_space<vmem>>, vector<1x16x128xf32>
    tpu.vector_store %arg11[%c0_32, %c0_33, %c0_34], %46 {strides = array<i32>} : memref<1x16x128xf32, #tpu.memory_space<vmem>>, vector<1x16x128xf32>,
    return
  }
  func.func @transform_0(%arg0: i32, %arg1: i32) -> (i32, i32, i32) {
    %c0_i32 = arith.constant 0 : i32
    %c0_i32_0 = arith.constant 0 : i32
    return %arg0, %arg1, %c0_i32 : i32, i32, i32
  }
  func.func @transform_1(%arg0: i32, %arg1: i32) -> (i32, i32, i32) {
    %c0_i32 = arith.constant 0 : i32
    %c0_i32_0 = arith.constant 0 : i32
    return %arg0, %arg1, %c0_i32 : i32, i32, i32
  }
  func.func @transform_2(%arg0: i32, %arg1: i32) -> (i32, i32, i32) {
    %c0_i32 = arith.constant 0 : i32
    %c0_i32_0 = arith.constant 0 : i32
    %c0_i32_1 = arith.constant 0 : i32
    return %arg0, %c0_i32, %c0_i32_0 : i32, i32, i32
  }
  func.func @transform_3(%arg0: i32, %arg1: i32) -> (i32, i32, i32) {
    %c0_i32 = arith.constant 0 : i32
    %c0_i32_0 = arith.constant 0 : i32
    %c0_i32_1 = arith.constant 0 : i32
    return %arg0, %c0_i32, %c0_i32_0 : i32, i32, i32
  }
  func.func @transform_4(%arg0: i32, %arg1: i32) -> (i32, i32, i32) {
    %c0_i32 = arith.constant 0 : i32
    %c0_i32_0 = arith.constant 0 : i32
    %c0_i32_1 = arith.constant 0 : i32
    return %arg0, %c0_i32, %c0_i32_0 : i32, i32, i32
  }
  func.func @transform_5(%arg0: i32, %arg1: i32) -> (i32, i32) {
    %c0_i32 = arith.constant 0 : i32
    %c0_i32_0 = arith.constant 0 : i32
    %c0_i32_1 = arith.constant 0 : i32
    return %c0_i32, %c0_i32_0 : i32, i32
  }
  func.func @transform_6(%arg0: i32, %arg1: i32) -> (i32, i32) {
    %c0_i32 = arith.constant 0 : i32
    %c0_i32_0 = arith.constant 0 : i32
    %c0_i32_1 = arith.constant 0 : i32
    return %c0_i32, %c0_i32_0 : i32, i32
  }
  func.func @transform_7(%arg0: i32, %arg1: i32) -> (i32, i32) {
    %c0_i32 = arith.constant 0 : i32
    %c0_i32_0 = arith.constant 0 : i32
    %c0_i32_1 = arith.constant 0 : i32
    return %c0_i32, %c0_i32_0 : i32, i32
  }
  func.func @transform_8(%arg0: i32, %arg1: i32) -> (i32, i32) {
    %c0_i32 = arith.constant 0 : i32
    %c0_i32_0 = arith.constant 0 : i32
    %c0_i32_1 = arith.constant 0 : i32
    return %c0_i32, %c0_i32_0 : i32, i32
  }
  func.func @transform_9(%arg0: i32, %arg1: i32) -> (i32, i32, i32) {
    %c0_i32 = arith.constant 0 : i32
    %c0_i32_0 = arith.constant 0 : i32
    return %arg0, %arg1, %c0_i32 : i32, i32, i32
  }
  func.func @transform_10(%arg0: i32, %arg1: i32) -> (i32, i32, i32) {
    %c0_i32 = arith.constant 0 : i32
    %c0_i32_0 = arith.constant 0 : i32
    return %arg0, %arg1, %c0_i32 : i32, i32, i32
  }
}

</mosaic_0001>

<bundles_post_ra>
// kernel: tpu_custom_call.1
= control target key start
LH: loop header
LB: loop body
LE: loop exit
PB: predicated region body
PF: predicated region fallthrough
CT: control target
= control target key end

     0   :  { %s2506_s0 = inlined_call_operand.hbm [shape: f32[2,16,128], index: 0, kind: input, shape index: {}]   ;;  %s2507_s1 = inlined_call_operand.hbm [shape: f32[2,16,128], index: 1, kind: input, shape index: {}]   ;;  %s2508_s2 = inlined_call_operand.hbm [shape: bf16[2,128,128], index: 2, kind: input, shape index: {}]   ;;  %s2509_s3 = inlined_call_operand.hbm [shape: bf16[2,128,128], index: 3, kind: input, shape index: {}]   ;;  %s2510_s4 = inlined_call_operand.vmem [shape: f32[2,1,128], index: 4, kind: input, shape index: {}]   ;;  %s2511_s5 = inlined_call_operand.hbm [shape: bf16[128,128], index: 5, kind: input, shape index: {}]   ;;  %s2512_s6 = inlined_call_operand.vmem [shape: f32[1,128], index: 6, kind: input, shape index: {}]   ;;  %s2513_s7 = inlined_call_operand.hbm [shape: bf16[128,128], index: 7, kind: input, shape index: {}]   ;;  %s2514_s8 = inlined_call_operand.vmem [shape: f32[1,128], index: 8, kind: input, shape index: {}]   ;;  %s2515_s9 = inlined_call_operand.hbm [shape: f32[2,16,128], index: 9, kind: output, shape index: {0}]   ;;  %s2516_s10 = inlined_call_operand.hbm [shape: bf16[2,16,128], index: 10, kind: output, shape index: {1}]  }
   0x1   :  { %2528 = sst [smem:[#allocation26_spill]] %s2506_s0 }
   0x2   :  { %2529 = sst [smem:[#allocation27_spill]] %s2508_s2 }
   0x3   :  { %2530 = sst [smem:[#allocation28_spill]] %s2509_s3 }
   0x4   :  { %2531 = sst [smem:[#allocation29_spill]] %s2511_s5 }
   0x5   :  { %2532 = sst [smem:[#allocation30_spill]] %s2514_s8 }
   0x6   :  { %2533 = sst [smem:[#allocation31_spill]] %s2515_s9 }
   0x7   :  { %2534 = sst [smem:[#allocation32_spill]] %s2516_s10 }
   0x8   :  { %16 = vsyncpa [#allocation3], 0 }
   0x9   :  { %18 = vsyncpa [#allocation3 + $0x1], 0 }
   0xa   :  { %19 = vsyncpa [#allocation6], 0 }
   0xb   :  { %21 = vsyncpa [#allocation6 + $0x1], 0 }
   0xc   :  { %22 = vsyncpa [#allocation9], 0 }
   0xd   :  { %23 = vsyncpa [#allocation12], 0 }
   0xe   :  { %24 = vsyncpa [#allocation4], 0 }
   0xf   :  { %26 = vsyncpa [#allocation4 + $0x1], 0 }
  0x10   :  { %27 = vsyncpa [#allocation15], 0 }
  0x11   :  { %29 = vsyncpa [#allocation15 + $0x1], 0  ;;  %s2014_s13 = smov 0   ;;  %s2016_s14 = smov 0  }
  0x12   :  { %s2018_s15 = smov 0   ;;  %s2020_s16 = smov 0  }
  0x13   :  { %s2022_s17 = smov 0   ;;  %s2024_s18 = smov 0  }
  0x14 LB: > { %2535 = sst [smem:[#allocation24_spill]] %s1919_s13  ;;  %s2045_s19 = sadd.s32 4294967295, %s1939_s18   ;;  %s1939_s18 = sphi %s2024_s18, %s35_s18   ;;  %s1935_s17 = sphi %s2022_s17, %s2570_s17   ;;  %s1931_s16 = sphi %s2020_s16, %s2569_s16   ;;  %s1927_s15 = sphi %s2018_s15, %s2568_s15   ;;  %s1923_s14 = sphi %s2016_s14, %s2567_s14   ;;  %s1919_s13 = sphi %s2014_s13, %s2566_s13  }
  0x15   : > { %s1278_s20 = sadd.s32 4294967294, %s1939_s18   ;;  %p69_p0 = scmp.ne.s32.totalorder %s1923_s14, %s1919_s13 }
  0x16   : > { %p2522_p1 = scmp.eq.s32.totalorder %s2045_s19, 0  ;;  %p291_p3 = scmp.eq.s32.totalorder %s1278_s20, 1 }
  0x17   : > { %p1279_p5 = scmp.ge.s32.totalorder %s1939_s18, 1  ;;  %p326_p7 = scmp.lt.s32.totalorder %s1939_s18, 3 }
  0x18   : > { %p2054_p4 = por %p2522_p1, %p69_p0  ;;  %p2059_p6 = por %p291_p3, %p69_p0 }
  0x19   : > { %s1345_s23 = sshll.u32 %s1931_s16, 10  ;;  %p2065_p8 = pnand %p1279_p5, %p326_p7 }
  0x1a   : > { %s2536_s21 = scalar_select %p2054_p4, 1, 0 }
  0x1b   : > { %s2537_s22 = scalar_select %p2059_p6, 1, 0 }
  0x1c   : > { %s2539_s24 = scalar_select %p2065_p8, 1, 0 }
  0x1d   : > { %2538 = sst [smem:[#allocation25_spill]] %s2537_s22  ;;  %s2540_s2 = sld [smem:[#allocation27_spill]] }
  0x1e   : > { %s1941_s28 = smov [#allocation7]   ;;  %p2521_p9 = pneg %p2065_p8 }
  0x1f   : > { %s341_s29 = sshll.u32 %s1941_s28, 4  ;;  %s2542_s3 = sld [smem:[#allocation28_spill]]  ;;  %s2076_s29 = int_to_ptr.vmem [resolvable:$true] %s341_s29 }
  0x20   : > { %p2083_p10 = pnand %p2521_p9, %p2054_p4  ;;  %s1942_s25 = smov [#allocation8]  }
  0x21   : > { %s2093_s26 = sshll.u32 %s1942_s25, 4  ;;  %s358_s26 = int_to_ptr.vmem [resolvable:$true] %s2093_s26 }
  0x22   : > { %p1631_p13 = pneg %p2083_p10 }
  0x23   : > { %s2072_s27 = scalar_lea.hbm %s2540_s2, %s1345_s23  ;;  %s1634_s9 = scalar_lea.hbm %s2540_s2, 2048 }
  0x24   : > { %s1629_s28 = scalar_lea.hbm %s2072_s27, 1024  ;;  %p1635_p5 = scmp.lt.u32.totalorder %s2072_s27, %s2540_s2 }
  0x25   : > { %s2091_s20 = scalar_lea.hbm %s2542_s3, %s1345_s23  ;;  %p1630_p12 = scmp.ne.s32.totalorder %s2072_s27, %s1629_s28 }
  0x26   : > { %p1636_p7 = scmp.lt.u32.totalorder %s1634_s9, %s1629_s28  ;;  %p1638_p2 = scmp.lt.u32.totalorder %s1629_s28, %s2072_s27 }
  0x27   : > { %p1632_p0 = pnand %p1631_p13, %p1630_p12 }
  0x28   : > { %p1637_p11 = por %p1636_p7, %p1635_p5 }
  0x29   : > { %p1633_p3 = pneg %p1632_p0 }
  0x2a   : > { %p1639_p9 = por %p1638_p2, %p1637_p11 }
  0x2c   : > { %p1640_p1 = pnand %p1639_p9, %p1633_p3 }
  0x2e   : > { %1643 = shalt.err (!%p1640_p1)
}
  0x2f   : > { %s1644_s23 = scalar_lea.vmem %s2076_s29, 1024  ;;  %p1652_p4 = scmp.lt.s32.totalorder %s2076_s29, %s2076_s29 }
  0x30   : > { %p1645_p12 = scmp.ne.s32.totalorder %s2076_s29, %s1644_s23  ;;  %p1653_p8 = scmp.lt.s32.totalorder %s1644_s23, %s1644_s23 }
  0x32   : > { %p1647_p0 = pnand %p1645_p12, %p1631_p13  ;;  %p1654_p5 = por %p1653_p8, %p1652_p4 }
  0x34   : > { %p1648_p6 = pneg %p1647_p0 }
  0x36   : > { %p1655_p7 = pnand %p1654_p5, %p1648_p6 }
  0x38   : > { %1658 = shalt.err (!%p1655_p7)
}
  0x39   : > { %s1943_s8 = smov 64   ;;  %s1944_s9 = smov 4  }
  0x3a   : > { %1497 = dma.hbm_to_vmem [thread:$0]  (!%p2083_p10), %s2072_s27, 1024, %s2076_s29, [#allocation6], %s1943_s8, %s1943_s8, %s1944_s9  }
  0x3b   : > { %s1659_s10 = scalar_lea.hbm %s2091_s20, 1024  ;;  %s1664_s11 = scalar_lea.hbm %s2542_s3, 2048 }
  0x3c   : > { %p1660_p1 = scmp.ne.s32.totalorder %s2091_s20, %s1659_s10  ;;  %p1665_p6 = scmp.lt.u32.totalorder %s2091_s20, %s2542_s3 }
  0x3d   : > { %p1666_p8 = scmp.lt.u32.totalorder %s1664_s11, %s1659_s10  ;;  %p1668_p11 = scmp.lt.u32.totalorder %s1659_s10, %s2091_s20 }
  0x3e   : > { %p1662_p2 = pnand %p1660_p1, %p1631_p13 }
  0x3f   : > { %p1667_p9 = por %p1666_p8, %p1665_p6 }
  0x40   : > { %p1663_p4 = pneg %p1662_p2 }
  0x41   : > { %p1669_p3 = por %p1668_p11, %p1667_p9 }
  0x43   : > { %p1670_p12 = pnand %p1669_p3, %p1663_p4 }
  0x45   : > { %1673 = shalt.err (!%p1670_p12)
}
  0x46   : > { %s1674_s27 = scalar_lea.vmem %s358_s26, 1024  ;;  %p1682_p1 = scmp.lt.s32.totalorder %s358_s26, %s358_s26 }
  0x47   : > { %p1675_p0 = scmp.ne.s32.totalorder %s358_s26, %s1674_s27  ;;  %p1683_p2 = scmp.lt.s32.totalorder %s1674_s27, %s1674_s27 }
  0x49   : > { %p1677_p5 = pnand %p1675_p0, %p1631_p13  ;;  %p1684_p6 = por %p1683_p2, %p1682_p1 }
  0x4b   : > { %p1678_p7 = pneg %p1677_p5 }
  0x4d   : > { %p1685_p8 = pnand %p1684_p6, %p1678_p7 }
  0x4f   : > { %1688 = shalt.err (!%p1685_p8)
}
  0x50   : > { %1500 = dma.hbm_to_vmem [thread:$0]  (!%p2083_p10), %s2091_s20, 1024, %s358_s26, [#allocation9], %s1943_s8, %s1943_s8, %s1944_s9  }
  0x51   : > { %s1945_s29 = smov [#allocation10]   ;;  %p2543_p4 = scmp.eq.s32.totalorder %s2045_s19, 0 }
  0x52   : > { %s376_s28 = sshll.u32 %s1945_s29, 4  ;;  %p2544_p9 = scmp.ne.s32.totalorder %s2539_s24, 0  ;;  %s377_s28 = int_to_ptr.vmem [resolvable:$true] %s376_s28 }
  0x53   : > { %s1946_s30 = smov [#allocation11]   ;;  %s2547_s5 = sld [smem:[#allocation29_spill]] }
  0x54   : > { %p2545_p13 = pneg %p2544_p9  ;;  %s392_s10 = sshll.u32 %s1946_s30, 4  ;;  %s393_s10 = int_to_ptr.vmem [resolvable:$true] %s392_s10 }
  0x56   : > { %p2152_p11 = pnand %p2545_p13, %p2543_p4 }
  0x58   : > { %p1691_p3 = pneg %p2152_p11 }
  0x59   : > { %s1689_s11 = scalar_lea.hbm %s2547_s5, 1024 }
  0x5a   : > { %p1690_p10 = scmp.ne.s32.totalorder %s2547_s5, %s1689_s11  ;;  %p1696_p5 = scmp.lt.u32.totalorder %s1689_s11, %s2547_s5 }
  0x5c   : > { %p1692_p12 = pnand %p1691_p3, %p1690_p10 }
  0x5e   : > { %p1693_p0 = pneg %p1692_p12 }
  0x60   : > { %p1698_p7 = pnand %p1696_p5, %p1693_p0 }
  0x62   : > { %1701 = shalt.err (!%p1698_p7)
}
  0x63   : > { %s1702_s27 = scalar_lea.vmem %s377_s28, 1024  ;;  %p1710_p8 = scmp.lt.s32.totalorder %s377_s28, %s377_s28 }
  0x64   : > { %p1703_p1 = scmp.ne.s32.totalorder %s377_s28, %s1702_s27  ;;  %p1711_p4 = scmp.lt.s32.totalorder %s1702_s27, %s1702_s27 }
  0x66   : > { %p1705_p2 = pnand %p1703_p1, %p1691_p3  ;;  %p1712_p13 = por %p1711_p4, %p1710_p8 }
  0x68   : > { %p1706_p6 = pneg %p1705_p2 }
  0x6a   : > { %p1713_p9 = pnand %p1712_p13, %p1706_p6 }
  0x6c   : > { %1716 = shalt.err (!%p1713_p9)
}
  0x6d   : > { %1503 = dma.hbm_to_vmem [thread:$0]  (!%p2152_p11), %s2547_s5, 1024, %s377_s28, [#allocation9], %s1943_s8, %s1943_s8, %s1944_s9  }
  0x6e   : > { %s1717_s11 = scalar_lea.hbm %s2513_s7, 1024 }
  0x6f   : > { %p1718_p10 = scmp.ne.s32.totalorder %s2513_s7, %s1717_s11  ;;  %p1724_p0 = scmp.lt.u32.totalorder %s1717_s11, %s2513_s7 }
  0x71   : > { %p1720_p9 = pnand %p1718_p10, %p1691_p3 }
  0x73   : > { %p1721_p12 = pneg %p1720_p9 }
  0x75   : > { %p1726_p5 = pnand %p1724_p0, %p1721_p12 }
  0x77   : > { %1729 = shalt.err (!%p1726_p5)
}
  0x78   : > { %s1730_s28 = scalar_lea.vmem %s393_s10, 1024  ;;  %p1738_p6 = scmp.lt.s32.totalorder %s393_s10, %s393_s10 }
  0x79   : > { %p1731_p7 = scmp.ne.s32.totalorder %s393_s10, %s1730_s28  ;;  %p1739_p8 = scmp.lt.s32.totalorder %s1730_s28, %s1730_s28 }
  0x7b   : > { %p1733_p1 = pnand %p1731_p7, %p1691_p3  ;;  %p1740_p4 = por %p1739_p8, %p1738_p6 }
  0x7d   : > { %p1734_p2 = pneg %p1733_p1 }
  0x7f   : > { %p1741_p13 = pnand %p1740_p4, %p1734_p2 }
  0x81   : > { %1744 = shalt.err (!%p1741_p13)
}
  0x82   : > { %1506 = dma.hbm_to_vmem [thread:$0]  (!%p2152_p11), %s2513_s7, 1024, %s393_s10, [#allocation12], %s1943_s8, %s1943_s8, %s1944_s9  }
  0x83   : > { %s56_s23 = sadd.s32 1, %s1927_s15  ;;  %s47_s30 = sadd.s32 1, %s1935_s17 }
  0x84   : > { %p63_p3 = scmp.ne.s32.totalorder %s1927_s15, %s1923_s14  ;;  %p49_p10 = scmp.ge.s32.totalorder %s47_s30, 2 }
  0x85   : > { %p64_p9 = scmp.eq.s32.totalorder %s1939_s18, 0  ;;  %p2548_p12 = scmp.eq.s32.totalorder %s2045_s19, 1 }
  0x86   : > { %p1523_p5 = scmp.lt.s32.totalorder %s1939_s18, 2  ;;  %s2572_s30 = smov (%p49_p10, %s47_s30), 0 }
  0x87   : > { %p2211_p0 = por %p2548_p12, %p63_p3  ;;  %p65_p7 = por %p64_p9, %p63_p3 }
  0x88   : > { %s409_s22 = sand.u32 1, %s1927_s15   ;;  %s51_s11 = ssub.s32 %s1935_s17, %s2572_s30 }
  0x89   : > { %p54_p11 = scmp.eq.s32.totalorder %s51_s11, 0  ;;  %s2221_s8 = sshll.u32 %s409_s22, 4 }
  0x8a   : > { %s2527_s9 = sshll.u32 %s1935_s17, 8  ;;  %s2550_s0 = sld [smem:[#allocation26_spill]] }
  0x8b   : > { %s2225_s10 = scalar_select %p54_p11, %s1927_s15, %s56_s23  }
  0x8c   : > { %s413_s25 = scalar_lea.vmem [#allocation2], %s2221_s8  ;;  %p2239_p1 = pnand %p1523_p5, %p65_p7 }
  0x8d   : > { %s422_s28 = sshll.u32 %s413_s25, 4  ;;  %s2243_s29 = scalar_lea.sflag [#allocation3], %s409_s22  ;;  %s2235_s28 = int_to_ptr.vmem [resolvable:$true] %s422_s28 }
  0x8e   : > { %p1747_p6 = pneg %p2239_p1 }
  0x90   : > { %s2232_s26 = scalar_lea.hbm %s2550_s0, %s2527_s9  ;;  %s1750_s20 = scalar_lea.hbm %s2550_s0, 512 }
  0x91   : > { %s1745_s23 = scalar_lea.hbm %s2232_s26, 256  ;;  %p1751_p13 = scmp.lt.u32.totalorder %s2232_s26, %s2550_s0 }
  0x92   : > { %p1746_p2 = scmp.ne.s32.totalorder %s2232_s26, %s1745_s23  ;;  %p1752_p3 = scmp.lt.u32.totalorder %s1750_s20, %s1745_s23 }
  0x93   : > { %p1754_p9 = scmp.lt.u32.totalorder %s1745_s23, %s2232_s26 }
  0x94   : > { %p1748_p8 = pnand %p1747_p6, %p1746_p2  ;;  %p1753_p10 = por %p1752_p3, %p1751_p13 }
  0x96   : > { %p1749_p4 = pneg %p1748_p8  ;;  %p1755_p12 = por %p1754_p9, %p1753_p10 }
  0x98   : > { %p1756_p5 = pnand %p1755_p12, %p1749_p4 }
  0x9a   : > { %1759 = shalt.err (!%p1756_p5)
}
  0x9b   : > { %s1760_s22 = scalar_lea.vmem %s2235_s28, 256  ;;  %s1947_s11 = smov [#allocation2]  }
  0x9c   : > { %p1761_p7 = scmp.ne.s32.totalorder %s2235_s28, %s1760_s22  ;;  %s1765_s12 = sshll.u32 %s1947_s11, 4  ;;  %s1766_s12 = int_to_ptr.vmem [resolvable:$false] %s1765_s12 }
  0x9d   : > { %s1767_s9 = scalar_lea.vmem %s1766_s12, 512  ;;  %p1768_p8 = scmp.lt.s32.totalorder %s2235_s28, %s1766_s12 }
  0x9e   : > { %p1763_p11 = pnand %p1761_p7, %p1747_p6  ;;  %p1769_p13 = scmp.lt.s32.totalorder %s1767_s9, %s1760_s22 }
  0xa0   : > { %p1764_p2 = pneg %p1763_p11  ;;  %p1770_p3 = por %p1769_p13, %p1768_p8 }
  0xa2   : > { %p1771_p10 = pnand %p1770_p3, %p1764_p2 }
  0xa4   : > { %1774 = shalt.err (!%p1771_p10)
}
  0xa5   : > { %s1948_s23 = smov 128   ;;  %s1949_s20 = smov 8  }
  0xa6   : > { %1510 = dma.hbm_to_vmem [thread:$0]  (!%p2239_p1), %s2232_s26, 256, %s2235_s28, %s2243_s29, %s1948_s23, %s1948_s23, %s1949_s20  }
  0xa7   : > { %s2552_s25 = sshll.u32 %s1935_s17, 8  ;;  %s436_s9 = scalar_lea.vmem [#allocation5], %s2221_s8 }
  0xa8   : > { %s2279_s12 = scalar_lea.hbm %s2507_s1, %s2552_s25  ;;  %s445_s0 = sshll.u32 %s436_s9, 4  ;;  %s2282_s0 = int_to_ptr.vmem [resolvable:$true] %s445_s0 }
  0xa9   : > { %s432_s2 = sand.u32 1, %s1939_s18   ;;  %s1775_s5 = scalar_lea.hbm %s2279_s12, 256 }
  0xaa   : > { %s2285_s3 = scalar_lea.sflag [#allocation6], %s432_s2  ;;  %p1776_p4 = scmp.ne.s32.totalorder %s2279_s12, %s1775_s5 }
  0xab   : > { %s1780_s29 = scalar_lea.hbm %s2507_s1, 512  ;;  %p1781_p5 = scmp.lt.u32.totalorder %s2279_s12, %s2507_s1 }
  0xac   : > { %p1778_p9 = pnand %p1776_p4, %p1747_p6  ;;  %p1782_p7 = scmp.lt.u32.totalorder %s1780_s29, %s1775_s5 }
  0xad   : > { %p1784_p2 = scmp.lt.u32.totalorder %s1775_s5, %s2279_s12 }
  0xae   : > { %p1779_p12 = pneg %p1778_p9  ;;  %p1783_p11 = por %p1782_p7, %p1781_p5 }
  0xb0   : > { %p1785_p8 = por %p1784_p2, %p1783_p11 }
  0xb2   : > { %p1786_p13 = pnand %p1785_p8, %p1779_p12 }
  0xb4   : > { %1789 = shalt.err (!%p1786_p13)
}
  0xb5   : > { %s1790_s2 = scalar_lea.vmem %s2282_s0, 256  ;;  %s1950_s8 = smov [#allocation5]  }
  0xb6   : > { %p1791_p3 = scmp.ne.s32.totalorder %s2282_s0, %s1790_s2  ;;  %s1795_s11 = sshll.u32 %s1950_s8, 4  ;;  %s1796_s11 = int_to_ptr.vmem [resolvable:$false] %s1795_s11 }
  0xb7   : > { %s1797_s9 = scalar_lea.vmem %s1796_s11, 512  ;;  %p1798_p9 = scmp.lt.s32.totalorder %s2282_s0, %s1796_s11 }
  0xb8   : > { %p1793_p10 = pnand %p1791_p3, %p1747_p6  ;;  %p1799_p5 = scmp.lt.s32.totalorder %s1797_s9, %s1790_s2 }
  0xba   : > { %p1794_p4 = pneg %p1793_p10  ;;  %p1800_p7 = por %p1799_p5, %p1798_p9 }
  0xbc   : > { %p1801_p11 = pnand %p1800_p7, %p1794_p4 }
  0xbe   : > { %1804 = shalt.err (!%p1801_p11)
}
  0xbf   : > { %1513 = dma.hbm_to_vmem [thread:$0]  (!%p2239_p1), %s2279_s12, 256, %s2282_s0, %s2285_s3, %s1948_s23, %s1948_s23, %s1949_s20  }
  0xc0   : > { %p2553_p6 = scmp.ne.s32.totalorder %s2539_s24, 0 }
  0xc1   : > { %s2317_s5 = sand.u32 (!%p2553_p6), 1, %s1923_s14   ;;  %p2554_p12 = scmp.ne.s32.totalorder (!%p2553_p6), %s2536_s21, 0 }
  0xc2   : > { %457 = sbr.rel (%p2553_p6) target bundleno = 1452 (0x5ac), region = 56  ;;  %s2320_s26 = sshll.u32 (!%p2553_p6), %s2317_s5, 4 }
  0xc3   : > { %s460_s27 = scalar_lea.sflag (!%p2553_p6), [#allocation3], %s2317_s5  ;;  %s463_s28 = scalar_lea.vmem (!%p2553_p6), [#allocation2], %s2320_s26 }
  0xc9   : > { %1886 = dma.done.wait (%p2554_p12), %s460_s27, 256  }
  0xca   : > { %1888 = vsyncadd (%p2554_p12), %s460_s27, 4294967040  ;;  %s468_s0 = sand.u32 1, %s2045_s19   ;;  %s472_s24 = scalar_lea.vmem [#allocation5], %s2320_s26 }
  0xcb   : > { %s469_s3 = scalar_lea.sflag [#allocation6], %s468_s0 }
  0xcc   : > { %1890 = dma.done.wait (%p2554_p12), %s469_s3, 256  }
  0xcd   : > { %1892 = vsyncadd (%p2554_p12), %s469_s3, 4294967040 }
  0xce   : > { %1894 = dma.done.wait (%p2554_p12), [#allocation6], 1024  }
  0xcf   : > { %1896 = vsyncadd (%p2554_p12), [#allocation6], 4294966272 }
  0xd0   : > { %1898 = dma.done.wait (%p2554_p12), [#allocation9], 1024  }
  0xd1   : > { %1900 = vsyncadd (%p2554_p12), [#allocation9], 4294966272  ;;  %p2555_p1 = scmp.eq.s32.totalorder %s2045_s19, 0 }
  0xd3   : > { %1902 = dma.done.wait (%p2555_p1), [#allocation9], 1024   ;;  %p2556_p2 = pmov %p2555_p1 }
  0xd4   : > { %p2557_p8 = pmov %p2555_p1 }
  0xd5   : > { %1904 = vsyncadd (%p2556_p2), [#allocation9], 4294966272 }
  0xd6   : > { %1906 = dma.done.wait (%p2557_p8), [#allocation12], 1024   ;;  %p2558_p13 = pmov %p2555_p1 }
  0xd7   : > { %v1951_v0 = vmov 0.0   ;;  %vm1952_vm0 = vmmov 0   ;;  %v1589_v1 = vld [vmem:[#allocation10] sm:$0xff]   ;;  %v1590_v2 = vld [vmem:[#allocation10 + $0x8] sm:$0xff]   ;;  %v1591_v3 = vld [vmem:[#allocation10 + $0x10] sm:$0xff]   ;;  %p540_p3 = scmp.lt.s32.totalorder %s1931_s16, 1 }
  0xd8   : > { %1908 = vsyncadd (%p2558_p13), [#allocation12], 4294966272  ;;  %1394 = vmatprep.subr.bf16.mxu0 %v1951_v0  ;;  %1410 = vmatprep.mubr.msk.bf16.mxu0 %vm1952_vm0, %v1951_v0  ;;  %v1597_v4 = vld [vmem:[#allocation7] sm:$0xff]   ;;  %v1592_v5 = vld [vmem:[#allocation10 + $0x18] sm:$0xff]   ;;  %s1299_s25 = sshll.u32 %s2317_s5, 3  ;;  %s1352_s2 = sshll.u32 %s1931_s16, 7 }
  0xd9   : > { %1414 = vmatprep.subr.bf16.mxu1 %v1951_v0  ;;  %1430 = vmatprep.mubr.msk.bf16.mxu1 %vm1952_vm0, %v1951_v0  ;;  %v1598_v6 = vld [vmem:[#allocation7 + $0x8] sm:$0xff]   ;;  %v1593_v7 = vld [vmem:[#allocation10 + $0x20] sm:$0xff]   ;;  %v1599_v8 = vld [vmem:[#allocation7 + $0x10] sm:$0xff]   ;;  %s541_s23 = scalar_select %p540_p3, %s1931_s16, 1 }
  0xda   : > { %1395 = vmatpush3.bf16.msra.mxu0 %v1589_v1  ;;  %1415 = vmatpush3.bf16.msra.mxu1 %v1597_v4  ;;  %v1594_v9 = vld [vmem:[#allocation10 + $0x28] sm:$0xff]   ;;  %v1600_v10 = vld [vmem:[#allocation7 + $0x18] sm:$0xff]   ;;  %v1595_v11 = vld [vmem:[#allocation10 + $0x30] sm:$0xff]   ;;  %s537_s22 = scalar_lea.vmem [#allocation14], %s1299_s25  ;;  %s2559_s9 = sld [smem:[#allocation32_spill]] }
  0xdb   : > { %1396 = vmatprep.subr.bf16.mxu0 %v1951_v0  ;;  %1416 = vmatprep.subr.bf16.mxu1 %v1951_v0  ;;  %v1601_v12 = vld [vmem:[#allocation7 + $0x20] sm:$0xff]   ;;  %v1596_v13 = vld [vmem:[#allocation10 + $0x38] sm:$0xff]   ;;  %v1602_v17 = vld [vmem:[#allocation7 + $0x28] sm:$0xff]   ;;  %s542_s29 = scalar_lea.vmem %s2510_s4, %s541_s23  ;;  %s1042_s0 = scalar_lea.sflag [#allocation15], %s2317_s5 }
  0xdc   : > { %v2368_v14 = vld [vmem:[%s463_s28] sm:$0xff]  ;;  %v2372_v15 = vld [vmem:[%s463_s28 + $0x8] sm:$0xff]  ;;  %s1075_s28 = sshll.u32 %s537_s22, 4  ;;  %s2419_s28 = int_to_ptr.vmem [resolvable:$true] %s1075_s28 }
  0xdd   : > { %v548_v16 = vpack.c.bf16 %v2372_v15, %v2368_v14  ;;  %v1603_v18 = vld [vmem:[#allocation7 + $0x30] sm:$0xff]   ;;  %v1604_v19 = vld [vmem:[#allocation7 + $0x38] sm:$0xff]   ;;  %v1308_v20 = vld [vmem:[%s2512_s6] ss:$0 sm:$0xff]  ;;  %s1805_s3 = scalar_lea.vmem %s2419_s28, 128 }
  0xde   : > { %1397 = vmatpush3.bf16.msra.mxu0 %v1590_v2  ;;  %1417 = vmatpush3.bf16.msra.mxu1 %v1598_v6  ;;  %v663_v22 = vld [vmem:[%s472_s24] sm:$0xff]  ;;  %v664_v26 = vld [vmem:[%s472_s24 + $0x8] sm:$0xff]  ;;  %p1806_p10 = scmp.ne.s32.totalorder %s2419_s28, %s1805_s3  ;;  %s1953_s24 = smov [#allocation14]  }
  0xdf   : > { %1398 = vmatprep.subr.bf16.mxu0 %v1951_v0  ;;  %1418 = vmatprep.subr.bf16.mxu1 %v1951_v0  ;;  %v1309_v34 = vld [vmem:[%s542_s29] ss:$0 sm:$0xff]  ;;  %v1606_v42 = vld [vmem:[#allocation8 + $0x8] sm:$0xff]   ;;  %v1607_v43 = vld [vmem:[#allocation8 + $0x10] sm:$0xff]   ;;  %s1809_s19 = sshll.u32 %s1953_s24, 4  ;;  %s1810_s19 = int_to_ptr.vmem [resolvable:$false] %s1809_s19 }
  0xe0   : > { %v1605_v41 = vld [vmem:[#allocation8] sm:$0xff]   ;;  %v1608_v52 = vld [vmem:[#allocation8 + $0x18] sm:$0xff]   ;;  %v1610_v54 = vld [vmem:[#allocation8 + $0x28] sm:$0xff]   ;;  %s2417_s27 = scalar_lea.hbm %s2559_s9, %s1352_s2  ;;  %p1807_p4 = pnand %p1806_p10, %p2211_p0 }
  0xe1   : > { %v1609_v53 = vld [vmem:[#allocation8 + $0x20] sm:$0xff]   ;;  %v1611_v55 = vld [vmem:[#allocation8 + $0x30] sm:$0xff]   ;;  %v1612_v56 = vld [vmem:[#allocation8 + $0x38] sm:$0xff]   ;;  %s1811_s21 = scalar_lea.vmem %s1810_s19, 256  ;;  %p1812_p5 = scmp.lt.s32.totalorder %s2419_s28, %s1810_s19 }
  0xe2   : > { %1399 = vmatpush3.bf16.msra.mxu0 %v1591_v3  ;;  %1419 = vmatpush3.bf16.msra.mxu1 %v1599_v8  ;;  %v1613_v57 = vld [vmem:[#allocation11] sm:$0xff]   ;;  %v1614_v58 = vld [vmem:[#allocation11 + $0x8] sm:$0xff]   ;;  %v1615_v59 = vld [vmem:[#allocation11 + $0x10] sm:$0xff]   ;;  %p1808_p9 = pneg %p1807_p4  ;;  %p1813_p7 = scmp.lt.s32.totalorder %s1811_s21, %s1805_s3 }
  0xe3   : > { %1400 = vmatprep.subr.bf16.mxu0 %v1951_v0  ;;  %1420 = vmatprep.subr.bf16.mxu1 %v1951_v0  ;;  %v1616_v60 = vld [vmem:[#allocation11 + $0x18] sm:$0xff]   ;;  %v1617_v61 = vld [vmem:[#allocation11 + $0x20] sm:$0xff]   ;;  %v1618_v62 = vld [vmem:[#allocation11 + $0x28] sm:$0xff]  }
  0xe4   : > { %v1619_v63 = vld [vmem:[#allocation11 + $0x30] sm:$0xff]   ;;  %v1620_v8 = vld [vmem:[#allocation11 + $0x38] sm:$0xff]   ;;  %p1814_p11 = por %p1813_p7, %p1812_p5 }
  0xe6   : > { %1401 = vmatpush3.bf16.msra.mxu0 %v1592_v5  ;;  %1421 = vmatpush3.bf16.msra.mxu1 %v1600_v10  ;;  %p1815_p6 = pnand %p1814_p11, %p1808_p9 }
  0xe7   : > { %1402 = vmatprep.subr.bf16.mxu0 %v1951_v0  ;;  %1422 = vmatprep.subr.bf16.mxu1 %v1951_v0 }
  0xea   : > { %1403 = vmatpush3.bf16.msra.mxu0 %v1593_v7  ;;  %1423 = vmatpush3.bf16.msra.mxu1 %v1601_v12 }
  0xeb   : > { %1404 = vmatprep.subr.bf16.mxu0 %v1951_v0  ;;  %1424 = vmatprep.subr.bf16.mxu1 %v1951_v0 }
  0xee   : > { %1405 = vmatpush3.bf16.msra.mxu0 %v1594_v9  ;;  %1425 = vmatpush3.bf16.msra.mxu1 %v1602_v17 }
  0xef   : > { %1406 = vmatprep.subr.bf16.mxu0 %v1951_v0  ;;  %1426 = vmatprep.subr.bf16.mxu1 %v1951_v0 }
  0xf2   : > { %1407 = vmatpush3.bf16.msra.mxu0 %v1595_v11  ;;  %1427 = vmatpush3.bf16.msra.mxu1 %v1603_v18 }
  0xf3   : > { %1408 = vmatprep.subr.bf16.mxu0 %v1951_v0  ;;  %1428 = vmatprep.subr.bf16.mxu1 %v1951_v0 }
  0xf6   : > { %1409 = vmatpush3.bf16.msra.mxu0 %v1596_v13  ;;  %1429 = vmatpush3.bf16.msra.mxu1 %v1604_v19 }
  0xf7   : > { %1434 = vmatprep.subr.bf16.mxu0 %v1951_v0  ;;  %1454 = vmatprep.subr.bf16.mxu1 %v1951_v0 }
  0xf9   : > { %1411 = vmatmul.mubr.bf16.vlgmr.msra.gmra.mrb[0].mxu0 %v548_v16 }
  0xfa   : > { %1450 = vmatprep.mubr.msk.bf16.mxu0 %vm1952_vm0, %v1951_v0  ;;  %1435 = vmatpush3.bf16.msra.mxu0 %v1605_v41 }
  0xfb   : > { %1436 = vmatprep.subr.bf16.mxu0 %v1951_v0 }
  0xfe   : > { %1437 = vmatpush3.bf16.msra.mxu0 %v1606_v42 }
  0xff   : > { %1438 = vmatprep.subr.bf16.mxu0 %v1951_v0 }
 0x102   : > { %1439 = vmatpush3.bf16.msra.mxu0 %v1607_v43 }
 0x103   : > { %1440 = vmatprep.subr.bf16.mxu0 %v1951_v0 }
 0x106   : > { %1441 = vmatpush3.bf16.msra.mxu0 %v1608_v52 }
 0x107   : > { %1442 = vmatprep.subr.bf16.mxu0 %v1951_v0 }
 0x10a   : > { %1443 = vmatpush3.bf16.msra.mxu0 %v1609_v53 }
 0x10b   : > { %1444 = vmatprep.subr.bf16.mxu0 %v1951_v0 }
 0x10e   : > { %1445 = vmatpush3.bf16.msra.mxu0 %v1610_v54 }
 0x10f   : > { %1446 = vmatprep.subr.bf16.mxu0 %v1951_v0 }
 0x112   : > { %1447 = vmatpush3.bf16.msra.mxu0 %v1611_v55 }
 0x113   : > { %1448 = vmatprep.subr.bf16.mxu0 %v1951_v0 }
 0x116   : > { %1449 = vmatpush3.bf16.msra.mxu0 %v1612_v56 }
 0x1cc   : > { %v647_v21 = vpop.f32.mrb[0].mxu0 }
 0x1cd   : > { %v661_v23 = vadd.f32 %v1308_v20, %v647_v21  ;;  %v1412_v24 = vpop.f32.mrb[1].mxu0 }
 0x1ce   : > { %v650_v25 = vpop.f32.mrb[2].mxu0 }
 0x1cf   : > { %v665_v27 = vadd.f32 %v663_v22, %v661_v23  ;;  %v662_v28 = vadd.f32 %v1308_v20, %v650_v25  ;;  %v1413_v29 = vpop.f32.mrb[3].mxu0 }
 0x1d1   : > { %v666_v30 = vadd.f32 %v664_v26, %v662_v28  ;;  %v667_v31 = vmul.f32 0.70710677, %v665_v27 }
 0x1d3   : > { %v668_v32 = vmul.f32 0.70710677, %v666_v30 }
 0x1d5   : > { %v669_v33 = vpack.c.bf16 %v668_v32, %v667_v31 }
 0x1d7   : > { %1431 = vmatmul.mubr.bf16.vlgmr.msra.gmra.mrb[0].mxu1 %v669_v33 }
 0x1d8   : > { %1470 = vmatprep.mubr.msk.bf16.mxu1 %vm1952_vm0, %v1951_v0  ;;  %1455 = vmatpush3.bf16.msra.mxu1 %v1613_v57 }
 0x1d9   : > { %1456 = vmatprep.subr.bf16.mxu1 %v1951_v0 }
 0x1dc   : > { %1457 = vmatpush3.bf16.msra.mxu1 %v1614_v58 }
 0x1dd   : > { %1458 = vmatprep.subr.bf16.mxu1 %v1951_v0 }
 0x1e0   : > { %1459 = vmatpush3.bf16.msra.mxu1 %v1615_v59 }
 0x1e1   : > { %1460 = vmatprep.subr.bf16.mxu1 %v1951_v0 }
 0x1e4   : > { %1461 = vmatpush3.bf16.msra.mxu1 %v1616_v60 }
 0x1e5   : > { %1462 = vmatprep.subr.bf16.mxu1 %v1951_v0 }
 0x1e8   : > { %1463 = vmatpush3.bf16.msra.mxu1 %v1617_v61 }
 0x1e9   : > { %1464 = vmatprep.subr.bf16.mxu1 %v1951_v0 }
 0x1ec   : > { %1465 = vmatpush3.bf16.msra.mxu1 %v1618_v62 }
 0x1ed   : > { %1466 = vmatprep.subr.bf16.mxu1 %v1951_v0 }
 0x1f0   : > { %1467 = vmatpush3.bf16.msra.mxu1 %v1619_v63 }
 0x1f1   : > { %1468 = vmatprep.subr.bf16.mxu1 %v1951_v0 }
 0x1f4   : > { %1469 = vmatpush3.bf16.msra.mxu1 %v1620_v8 }
 0x2aa   : > { %v775_v35 = vpop.f32.mrb[0].mxu1 }
 0x2ab   : > { %v776_v36 = vadd.f32 %v1309_v34, %v775_v35  ;;  %v1432_v37 = vpop.f32.mrb[1].mxu1 }
 0x2ac   : > { %v778_v38 = vpop.f32.mrb[2].mxu1 }
 0x2ad   : > { %782 = vmax.xlane.f32.xlu0 %v776_v36  ;;  %v1433_v39 = vpop.f32.mrb[3].mxu1  ;;  %v779_v40 = vadd.f32 %v1309_v34, %v778_v38 }
 0x2b1   : > { %784 = vmax.xlane.f32.xlu0 %v779_v40 }
 0x33a   : > { %v783_v44 = vpop.xlane.xlu0 %782 }
 0x33b   : > { %v786_v45 = vsub.f32 %v776_v36, %v783_v44 }
 0x33d   : > { %v788_v46 = vmul.f32 1.442695, %v786_v45 }
 0x33e   : > { %v785_v47 = vpop.xlane.xlu0 %784 }
 0x33f   : > { %1621 = vpow2.f32 %v788_v46  ;;  %v787_v48 = vsub.f32 %v779_v40, %v785_v47 }
 0x341   : > { %v790_v49 = vmul.f32 1.442695, %v787_v48 }
 0x343   : > { %1623 = vpow2.f32 %v790_v49 }
 0x349   : > { %v1622_v50 = vpop.eup %1621 }
 0x34a   : > { %792 = vadd.xlane.f32.xlu1 %v1622_v50 }
 0x34d   : > { %v1624_v51 = vpop.eup %1623 }
 0x34e   : > { %794 = vadd.xlane.f32.xlu1 %v1624_v51 }
 0x3d7   : > { %v793_v1 = vpop.xlane.xlu1 %792 }
 0x3d8   : > { %1625 = vrcp.f32 %v793_v1 }
 0x3db   : > { %v795_v2 = vpop.xlane.xlu1 %794 }
 0x3dc   : > { %1627 = vrcp.f32 %v795_v2 }
 0x3e2   : > { %v1626_v3 = vpop.eup %1625 }
 0x3e3   : > { %v798_v5 = vmul.f32 %v1626_v3, %v1622_v50 }
 0x3e6   : > { %v1628_v4 = vpop.eup %1627 }
 0x3e7   : > { %v799_v6 = vmul.f32 %v1628_v4, %v1624_v51 }
 0x3e9   : > { %v800_v7 = vpack.c.bf16 %v799_v6, %v798_v5 }
 0x3eb   : > { %1451 = vmatmul.mubr.bf16.vlgmr.msra.gmra.mrb[4].mxu0 %v800_v7  ;;  %1357 = vst [vmem:[%s537_s22] sm:$0xff] %v800_v7  }
 0x4be   : > { %v908_v9 = vpop.f32.mrb[4].mxu0 }
 0x4bf   : > { %v1452_v0 = vpop.f32.mrb[5].mxu0 }
 0x4c0   : > { %v911_v10 = vpop.f32.mrb[6].mxu0 }
 0x4c1   : > { %v915_v11 = vpack.c.bf16 %v911_v10, %v908_v9  ;;  %v1453_v12 = vpop.f32.mrb[7].mxu0 }
 0x4c3   : > { %1471 = vmatmul.mubr.bf16.vlgmr.msra.gmra.mrb[4].mxu1 %v915_v11 }
 0x4c4   : > { %1818 = shalt.err (!%p1815_p6)
}
 0x4c5   : > { %s1819_s23 = scalar_lea.hbm %s2417_s27, 128  ;;  %s1823_s29 = scalar_lea.hbm %s2559_s9, 256 }
 0x4c6   : > { %p1820_p12 = scmp.ne.s32.totalorder %s2417_s27, %s1819_s23  ;;  %p1824_p8 = scmp.lt.u32.totalorder %s2417_s27, %s2559_s9 }
 0x4c7   : > { %p1825_p13 = scmp.lt.u32.totalorder %s1823_s29, %s1819_s23  ;;  %p1827_p10 = scmp.lt.u32.totalorder %s1819_s23, %s2417_s27 }
 0x4c8   : > { %p1821_p1 = pnand %p1820_p12, %p2211_p0 }
 0x4c9   : > { %p1826_p3 = por %p1825_p13, %p1824_p8 }
 0x4ca   : > { %p1822_p2 = pneg %p1821_p1 }
 0x4cb   : > { %p1828_p4 = por %p1827_p10, %p1826_p3 }
 0x4cd   : > { %p1829_p9 = pnand %p1828_p4, %p1822_p2 }
 0x4cf   : > { %1832 = shalt.err (!%p1829_p9)
}
 0x4d0   : > { %s1954_s2 = smov 64   ;;  %s1955_s8 = smov 4   ;;  %v1030_v16 = vmul.f32 0.70710677, %v2368_v14  ;;  %v1031_v20 = vmul.f32 0.70710677, %v2372_v15 }
 0x4d1   : > { %1491 = dma.vmem_to_hbm [thread:$0]  (%p2211_p0), %s2419_s28, 128, %s2417_s27, %s1042_s0, %s1954_s2, %s1954_s2, %s1955_s8  }
 0x4d2   : > { %s2560_s24 = sld [smem:[#allocation30_spill]]  ;;  %s530_s19 = scalar_lea.vmem [#allocation13], %s2320_s26 }
 0x4d3   : > { %s1057_s21 = sshll.u32 %s530_s19, 4  ;;  %s1351_s23 = sshll.u32 %s1931_s16, 8  ;;  %s2452_s21 = int_to_ptr.vmem [resolvable:$true] %s1057_s21 }
 0x4d4   : > { %s2561_s0 = sld [smem:[#allocation31_spill]]  ;;  %s1037_s20 = scalar_lea.sflag [#allocation4], %s2317_s5 }
 0x4d5   : > { %s1833_s12 = scalar_lea.vmem %s2452_s21, 256  ;;  %s1956_s16 = smov [#allocation13]  }
 0x4d6   : > { %p1834_p5 = scmp.ne.s32.totalorder %s2452_s21, %s1833_s12  ;;  %s1837_s29 = sshll.u32 %s1956_s16, 4  ;;  %s1838_s29 = int_to_ptr.vmem [resolvable:$false] %s1837_s29 }
 0x4d7   : > { %s1839_s25 = scalar_lea.vmem %s1838_s29, 512  ;;  %p1840_p6 = scmp.lt.s32.totalorder %s2452_s21, %s1838_s29 }
 0x4d8   : > { %v1336_v13 = vld [vmem:[%s2560_s24] ss:$0 sm:$0xff]  ;;  %p1835_p7 = pnand %p1834_p5, %p2211_p0  ;;  %p1841_p12 = scmp.lt.s32.totalorder %s1839_s25, %s1833_s12 }
 0x4da   : > { %s2457_s26 = scalar_lea.hbm %s2561_s0, %s1351_s23  ;;  %p1836_p11 = pneg %p1835_p7 }
 0x4db   : > { %p1842_p1 = por %p1841_p12, %p1840_p6 }
 0x4dd   : > { %p1843_p2 = pnand %p1842_p1, %p1836_p11 }
 0x596   : > { %v1014_v17 = vpop.f32.mrb[4].mxu1 }
 0x597   : > { %v1028_v18 = vadd.f32 %v1336_v13, %v1014_v17  ;;  %v1472_v19 = vpop.f32.mrb[5].mxu1 }
 0x598   : > { %v1017_v21 = vpop.f32.mrb[6].mxu1 }
 0x599   : > { %v1032_v22 = vadd.f32 %v1030_v16, %v1028_v18  ;;  %v1029_v23 = vadd.f32 %v1336_v13, %v1017_v21  ;;  %v1473_v24 = vpop.f32.mrb[7].mxu1 }
 0x59b   : > { %1034 = vst [vmem:[%s530_s19] sm:$0xff] %v1032_v22  ;;  %v1033_v14 = vadd.f32 %v1031_v20, %v1029_v23 }
 0x59d   : > { %1035 = vst [vmem:[%s530_s19 + $0x8] sm:$0xff] %v1033_v14 }
 0x59e   : > { %1846 = shalt.err (!%p1843_p2)
}
 0x59f   : > { %s1847_s22 = scalar_lea.hbm %s2457_s26, 256  ;;  %s1851_s11 = scalar_lea.hbm %s2561_s0, 512 }
 0x5a0   : > { %p1848_p8 = scmp.ne.s32.totalorder %s2457_s26, %s1847_s22  ;;  %p1852_p10 = scmp.lt.u32.totalorder %s2457_s26, %s2561_s0 }
 0x5a1   : > { %p1853_p4 = scmp.lt.u32.totalorder %s1851_s11, %s1847_s22  ;;  %p1855_p5 = scmp.lt.u32.totalorder %s1847_s22, %s2457_s26 }
 0x5a2   : > { %p1849_p13 = pnand %p1848_p8, %p2211_p0 }
 0x5a3   : > { %p1854_p9 = por %p1853_p4, %p1852_p10 }
 0x5a4   : > { %p1850_p3 = pneg %p1849_p13 }
 0x5a5   : > { %p1856_p7 = por %p1855_p5, %p1854_p9 }
 0x5a7   : > { %p1857_p11 = pnand %p1856_p7, %p1850_p3 }
 0x5a9   : > { %1860 = shalt.err (!%p1857_p11)
}
 0x5aa   : > { %s1957_s19 = smov 128   ;;  %s1958_s23 = smov 8  }
 0x5ab   : > { %1490 = dma.vmem_to_hbm [thread:$0]  (%p2211_p0), %s2452_s21, 256, %s2457_s26, %s1037_s20, %s1957_s19, %s1957_s19, %s1958_s23  }
 0x5ac PF: > { %s2562_s27 = sld [smem:[#allocation24_spill]]  ;;  %s2563_s28 = sld [smem:[#allocation25_spill]] }
 0x5ad   : > { %p2565_p12 = scmp.ge.s32.totalorder %s1939_s18, 2 }
 0x5b2   : > { %s1090_s12 = sand.u32 1, %s2562_s27   ;;  %p2564_p6 = scmp.ne.s32.totalorder %s2563_s28, 0 }
 0x5b3   : > { %s1091_s16 = scalar_lea.sflag [#allocation4], %s1090_s12 }
 0x5b4   : > { %p1515_p1 = pnand %p2565_p12, %p2564_p6 }
 0x5b6   : > { %1910 = dma.done.wait (!%p1515_p1), %s1091_s16, 256  }
 0x5b7   : > { %1912 = vsyncadd (!%p1515_p1), %s1091_s16, 4294967040  ;;  %s1100_s29 = scalar_lea.sflag [#allocation15], %s1090_s12 }
 0x5b8   : > { %1914 = dma.done.wait (!%p1515_p1), %s1100_s29, 128  }
 0x5b9   : > { %1916 = vsyncadd (!%p1515_p1), %s1100_s29, 4294967168  ;;  %s35_s18 = sadd.s32 1, %s1939_s18   ;;  %s2566_s13 = smov %s1923_s14 }
 0x5ba   : > { %p32_p2 = scmp.ge.s32.totalorder %s35_s18, 4   ;;  %s2567_s14 = smov %s1927_s15 }
 0x5bb   : > { %s2568_s15 = smov %s2225_s10  ;;  %s2569_s16 = smov %s1935_s17 }
 0x5bc   : > { %s2570_s17 = smov %s2572_s30  ;;  %34 = sbr.rel (!%p32_p2) target bundleno = 20 (0x14), region = 152 }
 0x5c3   :  { %1105 = vsyncpa [#allocation3], 1 }
 0x5c4   :  { %1107 = vsyncpa [#allocation3 + $0x1], 1 }
 0x5c5   :  { %1108 = vsyncpa [#allocation6], 1 }
 0x5c6   :  { %1110 = vsyncpa [#allocation6 + $0x1], 1 }
 0x5c7   :  { %1111 = vsyncpa [#allocation9], 1 }
 0x5c8   :  { %1112 = vsyncpa [#allocation12], 1 }
 0x5c9   :  { %1113 = vsyncpa [#allocation4], 1 }
 0x5ca   :  { %1115 = vsyncpa [#allocation4 + $0x1], 1 }
 0x5cb   :  { %1116 = vsyncpa [#allocation15], 1 }
 0x5cc   :  { %1118 = vsyncpa [#allocation15 + $0x1], 1 }

// kernel: tpu_custom_call.1
= control target key start
LH: loop header
LB: loop body
LE: loop exit
PB: predicated region body
PF: predicated region fallthrough
CT: control target
= control target key end

     0   :  { %s2593_s0 = inlined_call_operand.hbm [shape: f32[2,16,128], index: 0, kind: input, shape index: {}]   ;;  %s2594_s1 = inlined_call_operand.hbm [shape: f32[2,16,128], index: 1, kind: input, shape index: {}]   ;;  %s2595_s2 = inlined_call_operand.hbm [shape: bf16[2,128,128], index: 2, kind: input, shape index: {}]   ;;  %s2596_s3 = inlined_call_operand.hbm [shape: bf16[2,128,128], index: 3, kind: input, shape index: {}]   ;;  %s2597_s4 = inlined_call_operand.vmem [shape: f32[2,1,128], index: 4, kind: input, shape index: {}]   ;;  %s2598_s5 = inlined_call_operand.hbm [shape: bf16[128,128], index: 5, kind: input, shape index: {}]   ;;  %s2599_s6 = inlined_call_operand.vmem [shape: f32[1,128], index: 6, kind: input, shape index: {}]   ;;  %s2600_s7 = inlined_call_operand.hbm [shape: bf16[128,128], index: 7, kind: input, shape index: {}]   ;;  %s2601_s8 = inlined_call_operand.vmem [shape: f32[1,128], index: 8, kind: input, shape index: {}]   ;;  %s2602_s9 = inlined_call_operand.hbm [shape: f32[2,16,128], index: 9, kind: output, shape index: {0}]   ;;  %s2603_s10 = inlined_call_operand.hbm [shape: bf16[2,16,128], index: 10, kind: output, shape index: {1}]  }
   0x1   :  { %2631 = sst [smem:[#allocation28_spill]] %s2593_s0 }
   0x2   :  { %2632 = sst [smem:[#allocation29_spill]] %s2594_s1 }
   0x3   :  { %2633 = sst [smem:[#allocation30_spill]] %s2597_s4 }
   0x4   :  { %2634 = sst [smem:[#allocation31_spill]] %s2598_s5 }
   0x5   :  { %2635 = sst [smem:[#allocation32_spill]] %s2601_s8 }
   0x6   :  { %2636 = sst [smem:[#allocation33_spill]] %s2602_s9 }
   0x7   :  { %2637 = sst [smem:[#allocation34_spill]] %s2603_s10 }
   0x8   :  { %16 = vsyncpa [#allocation3], 0 }
   0x9   :  { %18 = vsyncpa [#allocation3 + $0x1], 0 }
   0xa   :  { %19 = vsyncpa [#allocation6], 0 }
   0xb   :  { %21 = vsyncpa [#allocation6 + $0x1], 0 }
   0xc   :  { %22 = vsyncpa [#allocation9], 0 }
   0xd   :  { %24 = vsyncpa [#allocation9 + $0x1], 0 }
   0xe   :  { %25 = vsyncpa [#allocation12], 0 }
   0xf   :  { %26 = vsyncpa [#allocation4], 0 }
  0x10   :  { %28 = vsyncpa [#allocation4 + $0x1], 0 }
  0x11   :  { %29 = vsyncpa [#allocation15], 0 }
  0x12   :  { %31 = vsyncpa [#allocation15 + $0x1], 0  ;;  %s2061_s13 = smov 0   ;;  %s2063_s14 = smov 0  }
  0x13   :  { %s2065_s15 = smov 0   ;;  %s2067_s16 = smov 0  }
  0x14   :  { %s2069_s17 = smov 0   ;;  %s2071_s18 = smov 0  }
  0x15 LB: > { %2638 = sst [smem:[#allocation23_spill]] %s1966_s13  ;;  %s2092_s19 = sadd.s32 4294967295, %s1986_s18   ;;  %s1986_s18 = sphi %s2071_s18, %s37_s18   ;;  %s1982_s17 = sphi %s2069_s17, %s2691_s17   ;;  %s1978_s16 = sphi %s2067_s16, %s2690_s16   ;;  %s1974_s15 = sphi %s2065_s15, %s2689_s15   ;;  %s1970_s14 = sphi %s2063_s14, %s2688_s14   ;;  %s1966_s13 = sphi %s2061_s13, %s2687_s13  }
  0x16   : > { %s1327_s20 = sadd.s32 4294967294, %s1986_s18   ;;  %p65_p0 = scmp.ne.s32.totalorder %s1974_s15, %s1970_s14 }
  0x17   : > { %p66_p1 = scmp.eq.s32.totalorder %s1986_s18, 0  ;;  %p71_p2 = scmp.ne.s32.totalorder %s1970_s14, %s1966_s13 }
  0x18   : > { %p2607_p3 = scmp.eq.s32.totalorder %s2092_s19, 0  ;;  %p287_p4 = scmp.eq.s32.totalorder %s2092_s19, 1 }
  0x19   : > { %p2103_p5 = por %p66_p1, %p65_p0  ;;  %p293_p6 = scmp.eq.s32.totalorder %s1327_s20, 1 }
  0x1a   : > { %p2109_p7 = por %p2607_p3, %p71_p2  ;;  %p2113_p8 = por %p287_p4, %p65_p0 }
  0x1b   : > { %p2117_p9 = por %p293_p6, %p71_p2  ;;  %p1328_p10 = scmp.ge.s32.totalorder %s1986_s18, 1 }
  0x1c   : > { %s2640_s23 = scalar_select %p2109_p7, 1, 0 }
  0x1d   : > { %s2641_s24 = scalar_select %p2113_p8, 1, 0 }
  0x1e   : > { %s2643_s25 = scalar_select %p2117_p9, 1, 0 }
  0x1f   : > { %2642 = sst [smem:[#allocation24_spill]] %s2641_s24  ;;  %p328_p11 = scmp.lt.s32.totalorder %s1986_s18, 3 }
  0x20   : > { %2644 = sst [smem:[#allocation25_spill]] %s2643_s25  ;;  %s1988_s27 = smov [#allocation10]  }
  0x21   : > { %p2123_p12 = pnand %p1328_p10, %p328_p11  ;;  %s340_s28 = sshll.u32 %s1988_s27, 4  ;;  %s2127_s28 = int_to_ptr.vmem [resolvable:$true] %s340_s28 }
  0x22   : > { %s49_s30 = sadd.s32 1, %s1982_s17  ;;  %s2141_s11 = sand.u32 1, %s1974_s15  }
  0x23   : > { %s2645_s26 = scalar_select %p2123_p12, 1, 0 }
  0x24   : > { %p1547_p13 = pneg %p2123_p12  ;;  %p2143_p4 = scmp.ge.s32.totalorder %s49_s30, 2 }
  0x25   : > { %s2648_s5 = sld [smem:[#allocation31_spill]] }
  0x26   : > { %p2135_p2 = pnand %p1547_p13, %p2607_p3 }
  0x28   : > { %s2646_s29 = scalar_select %p2135_p2, 1, 0 }
  0x29   : > { %p2621_p10 = pneg %p2135_p2 }
  0x2b   : > { %s1680_s21 = scalar_lea.hbm %s2648_s5, 1024 }
  0x2c   : > { %p1681_p6 = scmp.ne.s32.totalorder %s2648_s5, %s1680_s21  ;;  %p1687_p0 = scmp.lt.u32.totalorder %s1680_s21, %s2648_s5 }
  0x2e   : > { %p1683_p11 = pnand %p2621_p10, %p1681_p6 }
  0x30   : > { %p1684_p13 = pneg %p1683_p11 }
  0x32   : > { %p1689_p3 = pnand %p1687_p0, %p1684_p13 }
  0x34   : > { %1692 = shalt.err (!%p1689_p3)
}
  0x35   : > { %s1693_s20 = scalar_lea.vmem %s2127_s28, 1024  ;;  %p1701_p7 = scmp.lt.s32.totalorder %s2127_s28, %s2127_s28 }
  0x36   : > { %p1694_p1 = scmp.ne.s32.totalorder %s2127_s28, %s1693_s20  ;;  %p1702_p6 = scmp.lt.s32.totalorder %s1693_s20, %s1693_s20 }
  0x38   : > { %p1696_p9 = pnand %p1694_p1, %p2621_p10  ;;  %p1703_p11 = por %p1702_p6, %p1701_p7 }
  0x3a   : > { %p1697_p8 = pneg %p1696_p9 }
  0x3c   : > { %p1704_p12 = pnand %p1703_p11, %p1697_p8 }
  0x3e   : > { %1707 = shalt.err (!%p1704_p12)
}
  0x3f   : > { %s2614_s8 = smov 64   ;;  %s2616_s9 = smov 4  }
  0x40   : > { %1550 = dma.hbm_to_vmem [thread:$0]  (!%p2135_p2), %s2648_s5, 1024, %s2127_s28, [#allocation9], %s2614_s8, %s2614_s8, %s2616_s9  }
  0x41   : > { %s2693_s30 = smov (%p2143_p4, %s49_s30), 0  ;;  %s2618_s25 = sshll.u32 %s2141_s11, 4 }
  0x42   : > { %2649 = sst [smem:[#allocation26_spill]] %s2693_s30  ;;  %s2619_s27 = sshll.u32 %s1982_s17, 8 }
  0x43   : > { %s53_s20 = ssub.s32 %s1982_s17, %s2693_s30  ;;  %p2650_p3 = scmp.lt.s32.totalorder %s1986_s18, 2 }
  0x44   : > { %p56_p8 = scmp.eq.s32.totalorder %s53_s20, 0  ;;  %s2652_s24 = sadd.s32 1, %s1974_s15 }
  0x45   : > { %p2189_p7 = pnand %p2650_p3, %p2103_p5  ;;  %s2620_s13 = sand.u32 1, %s1986_s18  }
  0x46   : > { %s2196_s4 = scalar_select %p56_p8, %s1974_s15, %s2652_s24  }
  0x47   : > { %s2651_s10 = scalar_select %p2189_p7, 1, 0 }
  0x48   : > { %2653 = sst [smem:[#allocation27_spill]] %s2196_s4  ;;  %s2654_s1 = sld [smem:[#allocation29_spill]] }
  0x49   : > { %s400_s22 = scalar_lea.vmem [#allocation5], %s2618_s25  ;;  %s2212_s20 = scalar_lea.sflag [#allocation6], %s2620_s13 }
  0x4a   : > { %s409_s8 = sshll.u32 %s400_s22, 4  ;;  %p2218_p9 = pneg %p2189_p7  ;;  %s2208_s8 = int_to_ptr.vmem [resolvable:$true] %s409_s8 }
  0x4c   : > { %s2655_s9 = scalar_select %p2218_p9, 1, 0 }
  0x4e   : > { %s2204_s21 = scalar_lea.hbm %s2654_s1, %s2619_s27  ;;  %s1713_s22 = scalar_lea.hbm %s2654_s1, 512 }
  0x4f   : > { %s1708_s24 = scalar_lea.hbm %s2204_s21, 256  ;;  %p1714_p1 = scmp.lt.u32.totalorder %s2204_s21, %s2654_s1 }
  0x50   : > { %p1709_p5 = scmp.ne.s32.totalorder %s2204_s21, %s1708_s24  ;;  %p1715_p4 = scmp.lt.u32.totalorder %s1713_s22, %s1708_s24 }
  0x51   : > { %p1717_p6 = scmp.lt.u32.totalorder %s1708_s24, %s2204_s21 }
  0x52   : > { %p1711_p12 = pnand %p2218_p9, %p1709_p5  ;;  %p1716_p13 = por %p1715_p4, %p1714_p1 }
  0x54   : > { %p1712_p0 = pneg %p1711_p12  ;;  %p1718_p11 = por %p1717_p6, %p1716_p13 }
  0x56   : > { %p1719_p3 = pnand %p1718_p11, %p1712_p0 }
  0x58   : > { %1722 = shalt.err (!%p1719_p3)
}
  0x59   : > { %s1723_s13 = scalar_lea.vmem %s2208_s8, 256  ;;  %s1991_s28 = smov [#allocation5]  }
  0x5a   : > { %p1724_p8 = scmp.ne.s32.totalorder %s2208_s8, %s1723_s13  ;;  %s1728_s12 = sshll.u32 %s1991_s28, 4  ;;  %s1729_s12 = int_to_ptr.vmem [resolvable:$false] %s1728_s12 }
  0x5b   : > { %s1730_s25 = scalar_lea.vmem %s1729_s12, 512  ;;  %p1731_p10 = scmp.lt.s32.totalorder %s2208_s8, %s1729_s12 }
  0x5c   : > { %p1726_p5 = pnand %p1724_p8, %p2218_p9  ;;  %p1732_p2 = scmp.lt.s32.totalorder %s1730_s25, %s1723_s13 }
  0x5e   : > { %p1727_p12 = pneg %p1726_p5  ;;  %p1733_p1 = por %p1732_p2, %p1731_p10 }
  0x60   : > { %p1734_p4 = pnand %p1733_p1, %p1727_p12 }
  0x62   : > { %1737 = shalt.err (!%p1734_p4)
}
  0x63   : > { %s2629_s27 = smov 128   ;;  %s2630_s24 = smov 8  }
  0x64   : > { %1560 = dma.hbm_to_vmem [thread:$0]  (!%p2189_p7), %s2204_s21, 256, %s2208_s8, %s2212_s20, %s2629_s27, %s2629_s27, %s2630_s24  }
  0x65   : > { %s1994_s22 = smov [#allocation11]   ;;  %s1738_s25 = scalar_lea.hbm %s2600_s7, 1024 }
  0x66   : > { %s356_s28 = sshll.u32 %s1994_s22, 4  ;;  %p1739_p2 = scmp.ne.s32.totalorder %s2600_s7, %s1738_s25  ;;  %s357_s28 = int_to_ptr.vmem [resolvable:$true] %s356_s28 }
  0x67   : > { %p2656_p10 = scmp.ne.s32.totalorder %s2646_s29, 0  ;;  %p1745_p11 = scmp.lt.u32.totalorder %s1738_s25, %s2600_s7 }
  0x69   : > { %p2657_p0 = pneg %p2656_p10 }
  0x6b   : > { %p1741_p13 = pnand %p1739_p2, %p2657_p0 }
  0x6d   : > { %p1742_p6 = pneg %p1741_p13 }
  0x6f   : > { %p1747_p3 = pnand %p1745_p11, %p1742_p6 }
  0x71   : > { %1750 = shalt.err (!%p1747_p3)
}
  0x72   : > { %s1751_s8 = scalar_lea.vmem %s357_s28, 1024  ;;  %p2658_p5 = pmov %p2657_p0 }
  0x73   : > { %p1752_p8 = scmp.ne.s32.totalorder %s357_s28, %s1751_s8  ;;  %p1759_p4 = scmp.lt.s32.totalorder %s357_s28, %s357_s28 }
  0x74   : > { %p1760_p7 = scmp.lt.s32.totalorder %s1751_s8, %s1751_s8 }
  0x75   : > { %p1754_p12 = pnand %p1752_p8, %p2658_p5 }
  0x76   : > { %p1761_p9 = por %p1760_p7, %p1759_p4 }
  0x77   : > { %p1755_p1 = pneg %p1754_p12 }
  0x79   : > { %p1762_p0 = pnand %p1761_p9, %p1755_p1 }
  0x7b   : > { %1765 = shalt.err (!%p1762_p0)
}
  0x7c   : > { %s2659_s1 = smov 4   ;;  %s2660_s5 = smov 64  }
  0x7d   : > { %1553 = dma.hbm_to_vmem [thread:$0]  (!%p2656_p10), %s2600_s7, 1024, %s357_s28, [#allocation12], %s2660_s5, %s2660_s5, %s2659_s1  }
  0x7e   : > { %s2661_s21 = sshll.u32 %s1982_s17, 8  ;;  %s2662_s0 = sld [smem:[#allocation28_spill]] }
  0x7f   : > { %s2663_s25 = sshll.u32 %s2141_s11, 4  ;;  %s1338_s4 = sshll.u32 %s2141_s11, 6 }
  0x80   : > { %s377_s29 = scalar_lea.vmem [#allocation2], %s2663_s25  ;;  %s374_s30 = scalar_lea.sflag [#allocation3], %s2141_s11 }
  0x81   : > { %s386_s8 = sshll.u32 %s377_s29, 4  ;;  %p2664_p9 = scmp.ne.s32.totalorder %s2655_s9, 0  ;;  %s2277_s8 = int_to_ptr.vmem [resolvable:$true] %s386_s8 }
  0x84   : > { %s2273_s13 = scalar_lea.hbm %s2662_s0, %s2661_s21  ;;  %s1771_s21 = scalar_lea.hbm %s2662_s0, 512 }
  0x85   : > { %s1766_s27 = scalar_lea.hbm %s2273_s13, 256  ;;  %p1772_p13 = scmp.lt.u32.totalorder %s2273_s13, %s2662_s0 }
  0x86   : > { %p1767_p7 = scmp.ne.s32.totalorder %s2273_s13, %s1766_s27  ;;  %p1773_p6 = scmp.lt.u32.totalorder %s1771_s21, %s1766_s27 }
  0x87   : > { %p1775_p3 = scmp.lt.u32.totalorder %s1766_s27, %s2273_s13 }
  0x88   : > { %p1769_p2 = pnand %p1767_p7, %p2664_p9  ;;  %p1774_p11 = por %p1773_p6, %p1772_p13 }
  0x8a   : > { %p1770_p10 = pneg %p1769_p2  ;;  %p1776_p8 = por %p1775_p3, %p1774_p11 }
  0x8c   : > { %p1777_p5 = pnand %p1776_p8, %p1770_p10 }
  0x8e   : > { %1780 = shalt.err (!%p1777_p5)
}
  0x8f   : > { %s1781_s25 = scalar_lea.vmem %s2277_s8, 256  ;;  %s1995_s29 = smov [#allocation2]  }
  0x90   : > { %p1782_p12 = scmp.ne.s32.totalorder %s2277_s8, %s1781_s25  ;;  %s1786_s28 = sshll.u32 %s1995_s29, 4  ;;  %s1787_s28 = int_to_ptr.vmem [resolvable:$false] %s1786_s28 }
  0x91   : > { %s1788_s24 = scalar_lea.vmem %s1787_s28, 512  ;;  %p1789_p0 = scmp.lt.s32.totalorder %s2277_s8, %s1787_s28 }
  0x92   : > { %p1784_p1 = pnand %p1782_p12, %p2664_p9  ;;  %p1790_p7 = scmp.lt.s32.totalorder %s1788_s24, %s1781_s25 }
  0x94   : > { %p1785_p4 = pneg %p1784_p1  ;;  %p1791_p2 = por %p1790_p7, %p1789_p0 }
  0x96   : > { %p1792_p13 = pnand %p1791_p2, %p1785_p4 }
  0x98   : > { %1795 = shalt.err (!%p1792_p13)
}
  0x99   : > { %p2665_p10 = scmp.ne.s32.totalorder %s2651_s10, 0  ;;  %s2666_s27 = smov 8  }
  0x9a   : > { %s2667_s22 = smov 128   ;;  %s1400_s21 = sshll.u32 %s1982_s17, 10 }
  0x9b   : > { %1557 = dma.hbm_to_vmem [thread:$0]  (!%p2665_p10), %s2273_s13, 256, %s2277_s8, %s374_s30, %s2667_s22, %s2667_s22, %s2666_s27  }
  0x9c   : > { %s2313_s29 = scalar_lea.hbm %s2595_s2, %s1400_s21  ;;  %s423_s28 = scalar_lea.vmem [#allocation7], %s1338_s4 }
  0x9d   : > { %s430_s24 = sshll.u32 %s423_s28, 4  ;;  %s1796_s0 = scalar_lea.hbm %s2313_s29, 1024  ;;  %s2317_s24 = int_to_ptr.vmem [resolvable:$true] %s430_s24 }
  0x9e   : > { %p1797_p6 = scmp.ne.s32.totalorder %s2313_s29, %s1796_s0  ;;  %s1801_s30 = scalar_lea.hbm %s2595_s2, 2048 }
  0x9f   : > { %p1802_p8 = scmp.lt.u32.totalorder %s2313_s29, %s2595_s2  ;;  %p1803_p5 = scmp.lt.u32.totalorder %s1801_s30, %s1796_s0 }
  0xa0   : > { %p1799_p11 = pnand %p1797_p6, %p2664_p9  ;;  %p1805_p1 = scmp.lt.u32.totalorder %s1796_s0, %s2313_s29 }
  0xa1   : > { %p1804_p12 = por %p1803_p5, %p1802_p8 }
  0xa2   : > { %p1800_p3 = pneg %p1799_p11 }
  0xa3   : > { %p1806_p4 = por %p1805_p1, %p1804_p12 }
  0xa5   : > { %p1807_p0 = pnand %p1806_p4, %p1800_p3 }
  0xa7   : > { %1810 = shalt.err (!%p1807_p0)
}
  0xa8   : > { %s1811_s12 = scalar_lea.vmem %s2317_s24, 1024  ;;  %s1996_s25 = smov [#allocation7]  }
  0xa9   : > { %p1812_p7 = scmp.ne.s32.totalorder %s2317_s24, %s1811_s12  ;;  %s1816_s28 = sshll.u32 %s1996_s25, 4  ;;  %s1817_s28 = int_to_ptr.vmem [resolvable:$false] %s1816_s28 }
  0xaa   : > { %s1818_s13 = scalar_lea.vmem %s1817_s28, 2048  ;;  %p1819_p6 = scmp.lt.s32.totalorder %s2317_s24, %s1817_s28 }
  0xab   : > { %p1814_p2 = pnand %p1812_p7, %p2664_p9  ;;  %p1820_p11 = scmp.lt.s32.totalorder %s1818_s13, %s1811_s12 }
  0xad   : > { %p1815_p13 = pneg %p1814_p2  ;;  %p1821_p8 = por %p1820_p11, %p1819_p6 }
  0xaf   : > { %p1822_p5 = pnand %p1821_p8, %p1815_p13 }
  0xb1   : > { %1825 = shalt.err (!%p1822_p5)
}
  0xb2   : > { %1563 = dma.hbm_to_vmem [thread:$0]  (!%p2665_p10), %s2313_s29, 1024, %s2317_s24, %s2212_s20, %s2660_s5, %s2660_s5, %s2659_s1  }
  0xb3   : > { %s2349_s30 = scalar_lea.hbm %s2596_s3, %s1400_s21  ;;  %s444_s27 = scalar_lea.vmem [#allocation8], %s1338_s4 }
  0xb4   : > { %s451_s22 = sshll.u32 %s444_s27, 4  ;;  %s2668_s12 = sand.u32 1, %s1986_s18   ;;  %s2353_s22 = int_to_ptr.vmem [resolvable:$true] %s451_s22 }
  0xb5   : > { %s2357_s25 = scalar_lea.sflag [#allocation9], %s2668_s12  ;;  %s1826_s28 = scalar_lea.hbm %s2349_s30, 1024 }
  0xb6   : > { %p1827_p3 = scmp.ne.s32.totalorder %s2349_s30, %s1826_s28  ;;  %s1831_s11 = scalar_lea.hbm %s2596_s3, 2048 }
  0xb7   : > { %p1832_p4 = scmp.lt.u32.totalorder %s2349_s30, %s2596_s3  ;;  %p1833_p0 = scmp.lt.u32.totalorder %s1831_s11, %s1826_s28 }
  0xb8   : > { %p1829_p12 = pnand %p1827_p3, %p2664_p9  ;;  %p1835_p2 = scmp.lt.u32.totalorder %s1826_s28, %s2349_s30 }
  0xb9   : > { %p1834_p7 = por %p1833_p0, %p1832_p4 }
  0xba   : > { %p1830_p1 = pneg %p1829_p12 }
  0xbb   : > { %p1836_p13 = por %p1835_p2, %p1834_p7 }
  0xbd   : > { %p1837_p6 = pnand %p1836_p13, %p1830_p1 }
  0xbf   : > { %1840 = shalt.err (!%p1837_p6)
}
  0xc0   : > { %s1841_s4 = scalar_lea.vmem %s2353_s22, 1024  ;;  %s1997_s13 = smov [#allocation8]  }
  0xc1   : > { %p1842_p11 = scmp.ne.s32.totalorder %s2353_s22, %s1841_s4  ;;  %s1846_s0 = sshll.u32 %s1997_s13, 4  ;;  %s1847_s0 = int_to_ptr.vmem [resolvable:$false] %s1846_s0 }
  0xc2   : > { %s1848_s8 = scalar_lea.vmem %s1847_s0, 2048  ;;  %p1849_p3 = scmp.lt.s32.totalorder %s2353_s22, %s1847_s0 }
  0xc3   : > { %p1844_p8 = pnand %p1842_p11, %p2664_p9  ;;  %p1850_p12 = scmp.lt.s32.totalorder %s1848_s8, %s1841_s4 }
  0xc5   : > { %p1845_p5 = pneg %p1844_p8  ;;  %p1851_p4 = por %p1850_p12, %p1849_p3 }
  0xc7   : > { %p1852_p0 = pnand %p1851_p4, %p1845_p5 }
  0xc9   : > { %1855 = shalt.err (!%p1852_p0)
}
  0xca   : > { %1566 = dma.hbm_to_vmem [thread:$0]  (!%p2665_p10), %s2349_s30, 1024, %s2353_s22, %s2357_s25, %s2660_s5, %s2660_s5, %s2659_s1  }
  0xcb   : > { %p2669_p9 = scmp.ne.s32.totalorder %s2645_s26, 0 }
  0xcc   : > { %s2387_s9 = sand.u32 (!%p2669_p9), 1, %s1970_s14   ;;  %p2670_p1 = scmp.ne.s32.totalorder (!%p2669_p9), %s2640_s23, 0 }
  0xcd   : > { %469 = sbr.rel (%p2669_p9) target bundleno = 1463 (0x5b7), region = 56  ;;  %s2390_s27 = sshll.u32 (!%p2669_p9), %s2387_s9, 4 }
  0xce   : > { %s472_s10 = scalar_lea.sflag (!%p2669_p9), [#allocation3], %s2387_s9  ;;  %s475_s12 = scalar_lea.vmem (!%p2669_p9), [#allocation2], %s2390_s27 }
  0xd4   : > { %1937 = dma.done.wait (%p2670_p1), %s472_s10, 256  }
  0xd5   : > { %1939 = vsyncadd (%p2670_p1), %s472_s10, 4294967040  ;;  %s480_s26 = sand.u32 1, %s2092_s19   ;;  %s484_s5 = scalar_lea.vmem [#allocation5], %s2390_s27 }
  0xd6   : > { %s481_s1 = scalar_lea.sflag [#allocation6], %s480_s26 }
  0xd7   : > { %1941 = dma.done.wait (%p2670_p1), %s481_s1, 1280  }
  0xd8   : > { %1943 = vsyncadd (%p2670_p1), %s481_s1, 4294966016  ;;  %s1347_s30 = sshll.u32 %s2387_s9, 6  ;;  %s499_s25 = scalar_lea.sflag [#allocation9], %s480_s26 }
  0xd9   : > { %s2405_s22 = scalar_lea.vmem [#allocation7], %s1347_s30  ;;  %s2407_s28 = scalar_lea.vmem [#allocation8], %s1347_s30 }
  0xda   : > { %1945 = dma.done.wait (%p2670_p1), %s499_s25, 1024  }
  0xdb   : > { %1947 = vsyncadd (%p2670_p1), %s499_s25, 4294966272  ;;  %p2671_p10 = scmp.eq.s32.totalorder %s2092_s19, 0 }
  0xdd   : > { %1949 = dma.done.wait (%p2671_p10), [#allocation9], 1024   ;;  %p2672_p7 = pmov %p2671_p10 }
  0xdf   : > { %1951 = vsyncadd (%p2672_p7), [#allocation9], 4294966272  ;;  %p2673_p2 = pmov %p2672_p7 }
  0xe1   : > { %1953 = dma.done.wait (%p2673_p2), [#allocation12], 1024   ;;  %p2674_p13 = pmov %p2673_p2 }
  0xe2   : > { %v1998_v0 = vmov 0.0   ;;  %vm1999_vm0 = vmmov 0   ;;  %v1640_v1 = vld [vmem:[#allocation10] sm:$0xff]   ;;  %v1641_v2 = vld [vmem:[#allocation10 + $0x8] sm:$0xff]   ;;  %v1642_v3 = vld [vmem:[#allocation10 + $0x10] sm:$0xff]   ;;  %p572_p6 = scmp.lt.s32.totalorder %s1978_s16, 1 }
  0xe3   : > { %1955 = vsyncadd (%p2674_p13), [#allocation12], 4294966272  ;;  %1447 = vmatprep.subr.bf16.mxu0 %v1998_v0  ;;  %1463 = vmatprep.mubr.msk.bf16.mxu0 %vm1999_vm0, %v1998_v0  ;;  %v1648_v4 = vld [vmem:[%s2405_s22] sm:$0xff]   ;;  %v1643_v5 = vld [vmem:[#allocation10 + $0x18] sm:$0xff]   ;;  %s2675_s29 = sld [smem:[#allocation30_spill]]  ;;  %s1352_s4 = sshll.u32 %s2387_s9, 3 }
  0xe4   : > { %1467 = vmatprep.subr.bf16.mxu1 %v1998_v0  ;;  %1483 = vmatprep.mubr.msk.bf16.mxu1 %vm1999_vm0, %v1998_v0  ;;  %v1649_v6 = vld [vmem:[%s2405_s22 + $0x8] sm:$0xff]   ;;  %v1644_v7 = vld [vmem:[#allocation10 + $0x20] sm:$0xff]   ;;  %v1650_v8 = vld [vmem:[%s2405_s22 + $0x10] sm:$0xff]   ;;  %s573_s20 = scalar_select %p572_p6, %s1978_s16, 1 }
  0xe5   : > { %1448 = vmatpush3.bf16.msra.mxu0 %v1640_v1  ;;  %1468 = vmatpush3.bf16.msra.mxu1 %v1648_v4  ;;  %v1645_v9 = vld [vmem:[#allocation10 + $0x28] sm:$0xff]   ;;  %v1651_v10 = vld [vmem:[%s2405_s22 + $0x18] sm:$0xff]   ;;  %v1646_v11 = vld [vmem:[#allocation10 + $0x30] sm:$0xff]   ;;  %s569_s13 = scalar_lea.vmem [#allocation14], %s1352_s4  ;;  %s2676_s0 = sld [smem:[#allocation24_spill]] }
  0xe6   : > { %1449 = vmatprep.subr.bf16.mxu0 %v1998_v0  ;;  %1469 = vmatprep.subr.bf16.mxu1 %v1998_v0  ;;  %v1652_v12 = vld [vmem:[%s2405_s22 + $0x20] sm:$0xff]   ;;  %v1647_v13 = vld [vmem:[#allocation10 + $0x38] sm:$0xff]   ;;  %v1653_v17 = vld [vmem:[%s2405_s22 + $0x28] sm:$0xff]   ;;  %s1405_s8 = sshll.u32 %s1978_s16, 7  ;;  %s2677_s26 = sld [smem:[#allocation34_spill]] }
  0xe7   : > { %v2444_v14 = vld [vmem:[%s475_s12] sm:$0xff]  ;;  %v2448_v15 = vld [vmem:[%s475_s12 + $0x8] sm:$0xff]  ;;  %s1074_s30 = scalar_lea.sflag [#allocation15], %s2387_s9  ;;  %s2000_s25 = smov [#allocation14]  }
  0xe8   : > { %v580_v16 = vpack.c.bf16 %v2448_v15, %v2444_v14  ;;  %v1654_v18 = vld [vmem:[%s2405_s22 + $0x30] sm:$0xff]   ;;  %v1655_v19 = vld [vmem:[%s2405_s22 + $0x38] sm:$0xff]   ;;  %v1361_v20 = vld [vmem:[%s2599_s6] ss:$0 sm:$0xff] }
  0xe9   : > { %1450 = vmatpush3.bf16.msra.mxu0 %v1641_v2  ;;  %1470 = vmatpush3.bf16.msra.mxu1 %v1649_v6  ;;  %v695_v22 = vld [vmem:[%s484_s5] sm:$0xff]  ;;  %v696_v26 = vld [vmem:[%s484_s5 + $0x8] sm:$0xff]  ;;  %s574_s24 = scalar_lea.vmem %s2675_s29, %s573_s20  ;;  %s1107_s5 = sshll.u32 %s569_s13, 4  ;;  %s2506_s5 = int_to_ptr.vmem [resolvable:$true] %s1107_s5 }
  0xea   : > { %1451 = vmatprep.subr.bf16.mxu0 %v1998_v0  ;;  %1471 = vmatprep.subr.bf16.mxu1 %v1998_v0  ;;  %v1362_v34 = vld [vmem:[%s574_s24] ss:$0 sm:$0xff]  ;;  %v1657_v42 = vld [vmem:[%s2407_s28 + $0x8] sm:$0xff]   ;;  %v1658_v43 = vld [vmem:[%s2407_s28 + $0x10] sm:$0xff]   ;;  %s1856_s22 = scalar_lea.vmem %s2506_s5, 128 }
  0xeb   : > { %v1656_v41 = vld [vmem:[%s2407_s28] sm:$0xff]   ;;  %v1659_v52 = vld [vmem:[%s2407_s28 + $0x18] sm:$0xff]   ;;  %v1661_v54 = vld [vmem:[%s2407_s28 + $0x28] sm:$0xff]   ;;  %p1857_p11 = scmp.ne.s32.totalorder %s2506_s5, %s1856_s22  ;;  %p2678_p8 = scmp.ne.s32.totalorder %s2676_s0, 0 }
  0xec   : > { %v1660_v53 = vld [vmem:[%s2407_s28 + $0x20] sm:$0xff]   ;;  %v1662_v55 = vld [vmem:[%s2407_s28 + $0x30] sm:$0xff]   ;;  %v1663_v56 = vld [vmem:[%s2407_s28 + $0x38] sm:$0xff]   ;;  %s2504_s1 = scalar_lea.hbm %s2677_s26, %s1405_s8  ;;  %s1860_s28 = sshll.u32 %s2000_s25, 4  ;;  %s1861_s28 = int_to_ptr.vmem [resolvable:$false] %s1860_s28 }
  0xed   : > { %1452 = vmatpush3.bf16.msra.mxu0 %v1642_v3  ;;  %1472 = vmatpush3.bf16.msra.mxu1 %v1650_v8  ;;  %v1664_v57 = vld [vmem:[#allocation11] sm:$0xff]   ;;  %v1665_v58 = vld [vmem:[#allocation11 + $0x8] sm:$0xff]   ;;  %v1666_v59 = vld [vmem:[#allocation11 + $0x10] sm:$0xff]   ;;  %p1858_p5 = pnand %p1857_p11, %p2678_p8  ;;  %s1862_s19 = scalar_lea.vmem %s1861_s28, 256 }
  0xee   : > { %1453 = vmatprep.subr.bf16.mxu0 %v1998_v0  ;;  %1473 = vmatprep.subr.bf16.mxu1 %v1998_v0  ;;  %v1667_v60 = vld [vmem:[#allocation11 + $0x18] sm:$0xff]   ;;  %v1668_v61 = vld [vmem:[#allocation11 + $0x20] sm:$0xff]   ;;  %v1669_v62 = vld [vmem:[#allocation11 + $0x28] sm:$0xff]   ;;  %p1863_p12 = scmp.lt.s32.totalorder %s2506_s5, %s1861_s28  ;;  %p1864_p4 = scmp.lt.s32.totalorder %s1862_s19, %s1856_s22 }
  0xef   : > { %v1670_v63 = vld [vmem:[#allocation11 + $0x30] sm:$0xff]   ;;  %v1671_v8 = vld [vmem:[#allocation11 + $0x38] sm:$0xff]   ;;  %p1859_p3 = pneg %p1858_p5 }
  0xf0   : > { %p1865_p0 = por %p1864_p4, %p1863_p12 }
  0xf1   : > { %1454 = vmatpush3.bf16.msra.mxu0 %v1643_v5  ;;  %1474 = vmatpush3.bf16.msra.mxu1 %v1651_v10 }
  0xf2   : > { %1455 = vmatprep.subr.bf16.mxu0 %v1998_v0  ;;  %1475 = vmatprep.subr.bf16.mxu1 %v1998_v0  ;;  %p1866_p9 = pnand %p1865_p0, %p1859_p3 }
  0xf5   : > { %1456 = vmatpush3.bf16.msra.mxu0 %v1644_v7  ;;  %1476 = vmatpush3.bf16.msra.mxu1 %v1652_v12 }
  0xf6   : > { %1457 = vmatprep.subr.bf16.mxu0 %v1998_v0  ;;  %1477 = vmatprep.subr.bf16.mxu1 %v1998_v0 }
  0xf9   : > { %1458 = vmatpush3.bf16.msra.mxu0 %v1645_v9  ;;  %1478 = vmatpush3.bf16.msra.mxu1 %v1653_v17 }
  0xfa   : > { %1459 = vmatprep.subr.bf16.mxu0 %v1998_v0  ;;  %1479 = vmatprep.subr.bf16.mxu1 %v1998_v0 }
  0xfd   : > { %1460 = vmatpush3.bf16.msra.mxu0 %v1646_v11  ;;  %1480 = vmatpush3.bf16.msra.mxu1 %v1654_v18 }
  0xfe   : > { %1461 = vmatprep.subr.bf16.mxu0 %v1998_v0  ;;  %1481 = vmatprep.subr.bf16.mxu1 %v1998_v0 }
 0x101   : > { %1462 = vmatpush3.bf16.msra.mxu0 %v1647_v13  ;;  %1482 = vmatpush3.bf16.msra.mxu1 %v1655_v19 }
 0x102   : > { %1487 = vmatprep.subr.bf16.mxu0 %v1998_v0  ;;  %1507 = vmatprep.subr.bf16.mxu1 %v1998_v0 }
 0x104   : > { %1464 = vmatmul.mubr.bf16.vlgmr.msra.gmra.mrb[0].mxu0 %v580_v16 }
 0x105   : > { %1503 = vmatprep.mubr.msk.bf16.mxu0 %vm1999_vm0, %v1998_v0  ;;  %1488 = vmatpush3.bf16.msra.mxu0 %v1656_v41 }
 0x106   : > { %1489 = vmatprep.subr.bf16.mxu0 %v1998_v0 }
 0x109   : > { %1490 = vmatpush3.bf16.msra.mxu0 %v1657_v42 }
 0x10a   : > { %1491 = vmatprep.subr.bf16.mxu0 %v1998_v0 }
 0x10d   : > { %1492 = vmatpush3.bf16.msra.mxu0 %v1658_v43 }
 0x10e   : > { %1493 = vmatprep.subr.bf16.mxu0 %v1998_v0 }
 0x111   : > { %1494 = vmatpush3.bf16.msra.mxu0 %v1659_v52 }
 0x112   : > { %1495 = vmatprep.subr.bf16.mxu0 %v1998_v0 }
 0x115   : > { %1496 = vmatpush3.bf16.msra.mxu0 %v1660_v53 }
 0x116   : > { %1497 = vmatprep.subr.bf16.mxu0 %v1998_v0 }
 0x119   : > { %1498 = vmatpush3.bf16.msra.mxu0 %v1661_v54 }
 0x11a   : > { %1499 = vmatprep.subr.bf16.mxu0 %v1998_v0 }
 0x11d   : > { %1500 = vmatpush3.bf16.msra.mxu0 %v1662_v55 }
 0x11e   : > { %1501 = vmatprep.subr.bf16.mxu0 %v1998_v0 }
 0x121   : > { %1502 = vmatpush3.bf16.msra.mxu0 %v1663_v56 }
 0x1d7   : > { %v679_v21 = vpop.f32.mrb[0].mxu0 }
 0x1d8   : > { %v693_v23 = vadd.f32 %v1361_v20, %v679_v21  ;;  %v1465_v24 = vpop.f32.mrb[1].mxu0 }
 0x1d9   : > { %v682_v25 = vpop.f32.mrb[2].mxu0 }
 0x1da   : > { %v697_v27 = vadd.f32 %v695_v22, %v693_v23  ;;  %v694_v28 = vadd.f32 %v1361_v20, %v682_v25  ;;  %v1466_v29 = vpop.f32.mrb[3].mxu0 }
 0x1dc   : > { %v698_v30 = vadd.f32 %v696_v26, %v694_v28  ;;  %v699_v31 = vmul.f32 0.70710677, %v697_v27 }
 0x1de   : > { %v700_v32 = vmul.f32 0.70710677, %v698_v30 }
 0x1e0   : > { %v701_v33 = vpack.c.bf16 %v700_v32, %v699_v31 }
 0x1e2   : > { %1484 = vmatmul.mubr.bf16.vlgmr.msra.gmra.mrb[0].mxu1 %v701_v33 }
 0x1e3   : > { %1523 = vmatprep.mubr.msk.bf16.mxu1 %vm1999_vm0, %v1998_v0  ;;  %1508 = vmatpush3.bf16.msra.mxu1 %v1664_v57 }
 0x1e4   : > { %1509 = vmatprep.subr.bf16.mxu1 %v1998_v0 }
 0x1e7   : > { %1510 = vmatpush3.bf16.msra.mxu1 %v1665_v58 }
 0x1e8   : > { %1511 = vmatprep.subr.bf16.mxu1 %v1998_v0 }
 0x1eb   : > { %1512 = vmatpush3.bf16.msra.mxu1 %v1666_v59 }
 0x1ec   : > { %1513 = vmatprep.subr.bf16.mxu1 %v1998_v0 }
 0x1ef   : > { %1514 = vmatpush3.bf16.msra.mxu1 %v1667_v60 }
 0x1f0   : > { %1515 = vmatprep.subr.bf16.mxu1 %v1998_v0 }
 0x1f3   : > { %1516 = vmatpush3.bf16.msra.mxu1 %v1668_v61 }
 0x1f4   : > { %1517 = vmatprep.subr.bf16.mxu1 %v1998_v0 }
 0x1f7   : > { %1518 = vmatpush3.bf16.msra.mxu1 %v1669_v62 }
 0x1f8   : > { %1519 = vmatprep.subr.bf16.mxu1 %v1998_v0 }
 0x1fb   : > { %1520 = vmatpush3.bf16.msra.mxu1 %v1670_v63 }
 0x1fc   : > { %1521 = vmatprep.subr.bf16.mxu1 %v1998_v0 }
 0x1ff   : > { %1522 = vmatpush3.bf16.msra.mxu1 %v1671_v8 }
 0x2b5   : > { %v807_v35 = vpop.f32.mrb[0].mxu1 }
 0x2b6   : > { %v808_v36 = vadd.f32 %v1362_v34, %v807_v35  ;;  %v1485_v37 = vpop.f32.mrb[1].mxu1 }
 0x2b7   : > { %v810_v38 = vpop.f32.mrb[2].mxu1 }
 0x2b8   : > { %814 = vmax.xlane.f32.xlu0 %v808_v36  ;;  %v1486_v39 = vpop.f32.mrb[3].mxu1  ;;  %v811_v40 = vadd.f32 %v1362_v34, %v810_v38 }
 0x2bc   : > { %816 = vmax.xlane.f32.xlu0 %v811_v40 }
 0x345   : > { %v815_v44 = vpop.xlane.xlu0 %814 }
 0x346   : > { %v818_v45 = vsub.f32 %v808_v36, %v815_v44 }
 0x348   : > { %v820_v46 = vmul.f32 1.442695, %v818_v45 }
 0x349   : > { %v817_v47 = vpop.xlane.xlu0 %816 }
 0x34a   : > { %1672 = vpow2.f32 %v820_v46  ;;  %v819_v48 = vsub.f32 %v811_v40, %v817_v47 }
 0x34c   : > { %v822_v49 = vmul.f32 1.442695, %v819_v48 }
 0x34e   : > { %1674 = vpow2.f32 %v822_v49 }
 0x354   : > { %v1673_v50 = vpop.eup %1672 }
 0x355   : > { %824 = vadd.xlane.f32.xlu1 %v1673_v50 }
 0x358   : > { %v1675_v51 = vpop.eup %1674 }
 0x359   : > { %826 = vadd.xlane.f32.xlu1 %v1675_v51 }
 0x3e2   : > { %v825_v1 = vpop.xlane.xlu1 %824 }
 0x3e3   : > { %1676 = vrcp.f32 %v825_v1 }
 0x3e6   : > { %v827_v2 = vpop.xlane.xlu1 %826 }
 0x3e7   : > { %1678 = vrcp.f32 %v827_v2 }
 0x3ed   : > { %v1677_v3 = vpop.eup %1676 }
 0x3ee   : > { %v830_v5 = vmul.f32 %v1677_v3, %v1673_v50 }
 0x3f1   : > { %v1679_v4 = vpop.eup %1678 }
 0x3f2   : > { %v831_v6 = vmul.f32 %v1679_v4, %v1675_v51 }
 0x3f4   : > { %v832_v7 = vpack.c.bf16 %v831_v6, %v830_v5 }
 0x3f6   : > { %1504 = vmatmul.mubr.bf16.vlgmr.msra.gmra.mrb[4].mxu0 %v832_v7  ;;  %1410 = vst [vmem:[%s569_s13] sm:$0xff] %v832_v7  }
 0x4c9   : > { %v940_v9 = vpop.f32.mrb[4].mxu0 }
 0x4ca   : > { %v1505_v0 = vpop.f32.mrb[5].mxu0 }
 0x4cb   : > { %v943_v10 = vpop.f32.mrb[6].mxu0 }
 0x4cc   : > { %v947_v11 = vpack.c.bf16 %v943_v10, %v940_v9  ;;  %v1506_v12 = vpop.f32.mrb[7].mxu0 }
 0x4ce   : > { %1524 = vmatmul.mubr.bf16.vlgmr.msra.gmra.mrb[4].mxu1 %v947_v11 }
 0x4cf   : > { %1869 = shalt.err (!%p1866_p9)
}
 0x4d0   : > { %s1870_s23 = scalar_lea.hbm %s2504_s1, 128  ;;  %s1874_s11 = scalar_lea.hbm %s2677_s26, 256 }
 0x4d1   : > { %p1871_p1 = scmp.ne.s32.totalorder %s2504_s1, %s1870_s23  ;;  %p1875_p2 = scmp.lt.u32.totalorder %s2504_s1, %s2677_s26 }
 0x4d2   : > { %p1876_p13 = scmp.lt.u32.totalorder %s1874_s11, %s1870_s23  ;;  %p1878_p11 = scmp.lt.u32.totalorder %s1870_s23, %s2504_s1 }
 0x4d3   : > { %p1872_p10 = pnand %p1871_p1, %p2678_p8 }
 0x4d4   : > { %p1877_p6 = por %p1876_p13, %p1875_p2 }
 0x4d5   : > { %p1873_p7 = pneg %p1872_p10 }
 0x4d6   : > { %p1879_p5 = por %p1878_p11, %p1877_p6 }
 0x4d8   : > { %p1880_p3 = pnand %p1879_p5, %p1873_p7 }
 0x4da   : > { %1883 = shalt.err (!%p1880_p3)
}
 0x4db   : > { %s2001_s4 = smov 64   ;;  %s2002_s13 = smov 4   ;;  %v1062_v16 = vmul.f32 0.70710677, %v2444_v14  ;;  %v1063_v20 = vmul.f32 0.70710677, %v2448_v15 }
 0x4dc   : > { %1544 = dma.vmem_to_hbm [thread:$0]  (%p2678_p8), %s2506_s5, 128, %s2504_s1, %s1074_s30, %s2001_s4, %s2001_s4, %s2002_s13  }
 0x4dd   : > { %s2679_s12 = sld [smem:[#allocation32_spill]]  ;;  %s562_s22 = scalar_lea.vmem [#allocation13], %s2390_s27 }
 0x4de   : > { %s1089_s25 = sshll.u32 %s562_s22, 4  ;;  %s1404_s28 = sshll.u32 %s1978_s16, 8  ;;  %s2539_s25 = int_to_ptr.vmem [resolvable:$true] %s1089_s25 }
 0x4df   : > { %s2680_s30 = sld [smem:[#allocation33_spill]]  ;;  %s1069_s19 = scalar_lea.sflag [#allocation4], %s2387_s9 }
 0x4e0   : > { %s1884_s23 = scalar_lea.vmem %s2539_s25, 256  ;;  %s2003_s16 = smov [#allocation13]  }
 0x4e1   : > { %p1885_p12 = scmp.ne.s32.totalorder %s2539_s25, %s1884_s23  ;;  %s1888_s20 = sshll.u32 %s2003_s16, 4  ;;  %s1889_s20 = int_to_ptr.vmem [resolvable:$false] %s1888_s20 }
 0x4e2   : > { %s1890_s21 = scalar_lea.vmem %s1889_s20, 512  ;;  %p1891_p9 = scmp.lt.s32.totalorder %s2539_s25, %s1889_s20 }
 0x4e3   : > { %v1389_v13 = vld [vmem:[%s2679_s12] ss:$0 sm:$0xff]  ;;  %p1886_p4 = pnand %p1885_p12, %p2678_p8  ;;  %p1892_p1 = scmp.lt.s32.totalorder %s1890_s21, %s1884_s23 }
 0x4e5   : > { %s2544_s27 = scalar_lea.hbm %s2680_s30, %s1404_s28  ;;  %p1887_p0 = pneg %p1886_p4 }
 0x4e6   : > { %p1893_p10 = por %p1892_p1, %p1891_p9 }
 0x4e8   : > { %p1894_p7 = pnand %p1893_p10, %p1887_p0 }
 0x5a1   : > { %v1046_v17 = vpop.f32.mrb[4].mxu1 }
 0x5a2   : > { %v1060_v18 = vadd.f32 %v1389_v13, %v1046_v17  ;;  %v1525_v19 = vpop.f32.mrb[5].mxu1 }
 0x5a3   : > { %v1049_v21 = vpop.f32.mrb[6].mxu1 }
 0x5a4   : > { %v1064_v22 = vadd.f32 %v1062_v16, %v1060_v18  ;;  %v1061_v23 = vadd.f32 %v1389_v13, %v1049_v21  ;;  %v1526_v24 = vpop.f32.mrb[7].mxu1 }
 0x5a6   : > { %1066 = vst [vmem:[%s562_s22] sm:$0xff] %v1064_v22  ;;  %v1065_v14 = vadd.f32 %v1063_v20, %v1061_v23 }
 0x5a8   : > { %1067 = vst [vmem:[%s562_s22 + $0x8] sm:$0xff] %v1065_v14 }
 0x5a9   : > { %1897 = shalt.err (!%p1894_p7)
}
 0x5aa   : > { %s1898_s11 = scalar_lea.hbm %s2544_s27, 256  ;;  %s1902_s4 = scalar_lea.hbm %s2680_s30, 512 }
 0x5ab   : > { %p1899_p2 = scmp.ne.s32.totalorder %s2544_s27, %s1898_s11  ;;  %p1903_p11 = scmp.lt.u32.totalorder %s2544_s27, %s2680_s30 }
 0x5ac   : > { %p1904_p5 = scmp.lt.u32.totalorder %s1902_s4, %s1898_s11  ;;  %p1906_p12 = scmp.lt.u32.totalorder %s1898_s11, %s2544_s27 }
 0x5ad   : > { %p1900_p13 = pnand %p1899_p2, %p2678_p8 }
 0x5ae   : > { %p1905_p3 = por %p1904_p5, %p1903_p11 }
 0x5af   : > { %p1901_p6 = pneg %p1900_p13 }
 0x5b0   : > { %p1907_p4 = por %p1906_p12, %p1905_p3 }
 0x5b2   : > { %p1908_p0 = pnand %p1907_p4, %p1901_p6 }
 0x5b4   : > { %1911 = shalt.err (!%p1908_p0)
}
 0x5b5   : > { %s2004_s10 = smov 128   ;;  %s2005_s12 = smov 8  }
 0x5b6   : > { %1543 = dma.vmem_to_hbm [thread:$0]  (%p2678_p8), %s2539_s25, 256, %s2544_s27, %s1069_s19, %s2004_s10, %s2004_s10, %s2005_s12  }
 0x5b7 PF: > { %s2681_s22 = sld [smem:[#allocation23_spill]]  ;;  %s2682_s28 = sld [smem:[#allocation25_spill]] }
 0x5b8   : > { %p2684_p1 = scmp.ge.s32.totalorder %s1986_s18, 2 }
 0x5bd   : > { %s1122_s1 = sand.u32 1, %s2681_s22   ;;  %p2683_p9 = scmp.ne.s32.totalorder %s2682_s28, 0 }
 0x5be   : > { %s1123_s5 = scalar_lea.sflag [#allocation4], %s1122_s1 }
 0x5bf   : > { %p1568_p10 = pnand %p2684_p1, %p2683_p9 }
 0x5c1   : > { %1957 = dma.done.wait (!%p1568_p10), %s1123_s5, 256  }
 0x5c2   : > { %1959 = vsyncadd (!%p1568_p10), %s1123_s5, 4294967040  ;;  %s1132_s23 = scalar_lea.sflag [#allocation15], %s1122_s1 }
 0x5c3   : > { %1961 = dma.done.wait (!%p1568_p10), %s1132_s23, 128  }
 0x5c4   : > { %1963 = vsyncadd (!%p1568_p10), %s1132_s23, 4294967168  ;;  %s37_s18 = sadd.s32 1, %s1986_s18   ;;  %s2685_s9 = sld [smem:[#allocation27_spill]] }
 0x5c5   : > { %p34_p7 = scmp.ge.s32.totalorder %s37_s18, 4   ;;  %s2686_s0 = sld [smem:[#allocation26_spill]] }
 0x5c6   : > { %s2687_s13 = smov %s1970_s14  ;;  %s2688_s14 = smov %s1974_s15 }
 0x5c7   : > { %s2690_s16 = smov %s1982_s17  ;;  %36 = sbr.rel (!%p34_p7) target bundleno = 21 (0x15), region = 166 }
 0x5ca   : > { %s2689_s15 = smov %s2685_s9 }
 0x5cb   : > { %s2691_s17 = smov %s2686_s0 }
 0x5ce   :  { %1137 = vsyncpa [#allocation3], 1 }
 0x5cf   :  { %1139 = vsyncpa [#allocation3 + $0x1], 1 }
 0x5d0   :  { %1140 = vsyncpa [#allocation6], 1 }
 0x5d1   :  { %1142 = vsyncpa [#allocation6 + $0x1], 1 }
 0x5d2   :  { %1143 = vsyncpa [#allocation9], 1 }
 0x5d3   :  { %1145 = vsyncpa [#allocation9 + $0x1], 1 }
 0x5d4   :  { %1146 = vsyncpa [#allocation12], 1 }
 0x5d5   :  { %1147 = vsyncpa [#allocation4], 1 }
 0x5d6   :  { %1149 = vsyncpa [#allocation4 + $0x1], 1 }
 0x5d7   :  { %1150 = vsyncpa [#allocation15], 1 }
 0x5d8   :  { %1152 = vsyncpa [#allocation15 + $0x1], 1 }

</bundles_post_ra>
